<compile_context>
chip_gen: v6e
topology: v6e:2x2x1
jax: 0.10.0
libtpu: 0.0.40
codegen_flags: <defaults>
</compile_context>

<pallas_src>
import jax
import jax.numpy as jnp
from jax.experimental import pallas as pl
from jax.experimental.pallas import tpu as pltpu

DIMS = [784, 512, 256, 128, 64, 10]
OUT_PAD = 128  # pad final layer to lane width for an unmasked, lane-dense store


def _round_up(n, m):
    return (n + m - 1) // m * m


def _pick_tm(batch):
    """Batch tile: big enough to amortize ~0.35us/step overhead, small enough for VMEM."""
    if batch >= 2048:
        return 1024          # ~13 MB working set, fits 32 MiB scoped VMEM everywhere
    if batch >= 512:
        return 512
    if batch >= 16:
        return _round_up(batch, 16)   # bf16 packs 16 rows per sublane group
    return _round_up(batch, 8)


def _mlp_kernel(x_ref, w1_ref, w2_ref, w3_ref, w4_ref, w5_ref, b_ref, o_ref):
    # x tile: (TM, 784) f32 (cast to bf16 on-chip); weights: bf16 (in, out);
    # b_ref: (5, 512) f32 packed biases; o_ref: (TM, 128) bf16 padded logits.
    b = b_ref[...]
    x = x_ref[...].astype(jnp.bfloat16)
    h = jnp.dot(x, w1_ref[...], preferred_element_type=jnp.float32)
    h = jnp.maximum(h + b[0:1, 0:512], 0.0).astype(jnp.bfloat16)
    h = jnp.dot(h, w2_ref[...], preferred_element_type=jnp.float32)
    h = jnp.maximum(h + b[1:2, 0:256], 0.0).astype(jnp.bfloat16)
    h = jnp.dot(h, w3_ref[...], preferred_element_type=jnp.float32)
    h = jnp.maximum(h + b[2:3, 0:128], 0.0).astype(jnp.bfloat16)
    h = jnp.dot(h, w4_ref[...], preferred_element_type=jnp.float32)
    h = jnp.maximum(h + b[3:4, 0:64], 0.0).astype(jnp.bfloat16)
    h = jnp.dot(h, w5_ref[...], preferred_element_type=jnp.float32)
    o_ref[...] = (h + b[4:5, 0:OUT_PAD]).astype(o_ref.dtype)


def init_params(key):
    """Per-layer (w (in,out) f32, b (out,) f32) with torch.nn.Linear-style init."""
    params = []
    for i, (fan_in, fan_out) in enumerate(zip(DIMS[:-1], DIMS[1:])):
        kw, kb = jax.random.split(jax.random.fold_in(key, i))
        bound = 1.0 / jnp.sqrt(fan_in)
        w = jax.random.uniform(kw, (fan_in, fan_out), jnp.float32, -bound, bound)
        b = jax.random.uniform(kb, (fan_out,), jnp.float32, -bound, bound)
        params.append((w, b))
    return params


def pack_params(params):
    """bf16 weights (last layer zero-padded to 128 cols) + one packed f32 bias array."""
    ws = []
    b_pack = jnp.zeros((len(params), DIMS[1]), jnp.float32)  # (5, 512)
    for i, (w, b) in enumerate(params):
        if i == len(params) - 1:
            w = jnp.pad(w, ((0, 0), (0, OUT_PAD - w.shape[1])))
        ws.append(w.astype(jnp.bfloat16))
        b_pack = b_pack.at[i, : b.shape[0]].set(b)
    return tuple(ws), b_pack


def net_forward(x, packed):
    """x: (B, 1, 28, 28) or anything reshapeable to (-1, 784). Returns (B, 10) f32 logits."""
    ws, b_pack = packed
    x2d = x.reshape(-1, DIMS[0])          # stays f32; bf16 cast happens in-kernel
    B = x2d.shape[0]
    TM = _pick_tm(B)

    full2d = lambda arr: pl.BlockSpec(arr.shape, lambda i: (0, 0))  # VMEM-resident

    out_pad = pl.pallas_call(
        _mlp_kernel,
        out_shape=jax.ShapeDtypeStruct((B, OUT_PAD), jnp.bfloat16),
        grid=(pl.cdiv(B, TM),),           # ragged last tile masked by Pallas
        in_specs=[pl.BlockSpec((TM, DIMS[0]), lambda i: (i, 0))]
        + [full2d(w) for w in ws]
        + [full2d(b_pack)],
        out_specs=pl.BlockSpec((TM, OUT_PAD), lambda i: (i, 0)),
        compiler_params=pltpu.CompilerParams(
            dimension_semantics=("parallel",),
            vmem_limit_bytes=32 * 1024 * 1024,
        ),
    )(x2d, *ws, b_pack)
    return out_pad[:, : DIMS[-1]].astype(jnp.float32)


def reference(x, params):
    """Plain-JAX reference with the same bf16-weight / f32-accumulate numerics."""
    h = x.reshape(-1, DIMS[0]).astype(jnp.bfloat16)
    for i, (w, b) in enumerate(params):
        h = jnp.dot(h, w.astype(jnp.bfloat16), preferred_element_type=jnp.float32) + b
        if i < len(params) - 1:
            h = jnp.maximum(h, 0.0).astype(jnp.bfloat16)
    return h


if __name__ == "__main__":
    key = jax.random.PRNGKey(0)
    k_x, k_p = jax.random.split(key)

    params = init_params(k_p)
    packed = pack_params(params)

    # MNIST-like input, NCHW, small batch.
    x = jax.random.normal(k_x, (8, 1, 28, 28), dtype=jnp.float32)

    logits = jax.jit(net_forward)(x, packed)
    logits = jax.block_until_ready(logits)

    ref = reference(x, params)
    assert logits.shape == (8, 10)
    assert jnp.allclose(logits, ref, atol=1e-2, rtol=1e-2), (
        float(jnp.max(jnp.abs(logits - ref))))

    print("KERNEL_OK")
</pallas_src>

<mosaic_0001>
module attributes {stable_mosaic.version = 11 : i64} {
  func.func @_mlp_kernel(%arg0: i32, %arg1: memref<8x784xf32, #tpu.memory_space<vmem>>, %arg2: memref<784x512xbf16, #tpu.memory_space<vmem>>, %arg3: memref<512x256xbf16, #tpu.memory_space<vmem>>, %arg4: memref<256x128xbf16, #tpu.memory_space<vmem>>, %arg5: memref<128x64xbf16, #tpu.memory_space<vmem>>, %arg6: memref<64x128xbf16, #tpu.memory_space<vmem>>, %arg7: memref<5x512xf32, #tpu.memory_space<vmem>>, %arg8: memref<8x128xbf16, #tpu.memory_space<vmem>>) attributes {dimension_semantics = [#tpu.dimension_semantics<parallel>], iteration_bounds = array<i64: 1>, scalar_prefetch = 0 : i64, scratch_operands = 0 : i64, tpu.core_type = #tpu.core_type<tc>, window_params = [{transform_indices = @transform_0, window_bounds = array<i64: 8, 784>}, {pipeline_mode = #tpu.pipeline_mode<synchronous>, transform_indices = @transform_1, window_bounds = array<i64: 784, 512>}, {pipeline_mode = #tpu.pipeline_mode<synchronous>, transform_indices = @transform_2, window_bounds = array<i64: 512, 256>}, {pipeline_mode = #tpu.pipeline_mode<synchronous>, transform_indices = @transform_3, window_bounds = array<i64: 256, 128>}, {pipeline_mode = #tpu.pipeline_mode<synchronous>, transform_indices = @transform_4, window_bounds = array<i64: 128, 64>}, {pipeline_mode = #tpu.pipeline_mode<synchronous>, transform_indices = @transform_5, window_bounds = array<i64: 64, 128>}, {pipeline_mode = #tpu.pipeline_mode<synchronous>, transform_indices = @transform_6, window_bounds = array<i64: 5, 512>}, {transform_indices = @transform_7, window_bounds = array<i64: 8, 128>}]} {
    %c0 = arith.constant 0 : index
    %c0_0 = arith.constant 0 : index
    %0 = vector.load %arg7[%c0, %c0_0] : memref<5x512xf32, #tpu.memory_space<vmem>>, vector<5x512xf32>
    %c0_1 = arith.constant 0 : index
    %c0_2 = arith.constant 0 : index
    %1 = vector.load %arg1[%c0_1, %c0_2] : memref<8x784xf32, #tpu.memory_space<vmem>>, vector<8x784xf32>
    %2 = arith.truncf %1 : vector<8x784xf32> to vector<8x784xbf16>
    %c0_3 = arith.constant 0 : index
    %c0_4 = arith.constant 0 : index
    %3 = vector.load %arg2[%c0_3, %c0_4] : memref<784x512xbf16, #tpu.memory_space<vmem>>, vector<784x512xbf16>
    %cst = arith.constant dense<0.000000e+00> : vector<8x512xf32>
    %4 = tpu.matmul %2, %3, %cst {dimension_numbers = #tpu.dot_dimension_numbers<[1], [0], [0], [1], [0, 0, 1, 1], [], []>} : vector<8x784xbf16>, vector<784x512xbf16>, vector<8x512xf32> -> vector<8x512xf32>
    %5 = vector.extract_strided_slice %0 {offsets = [0, 0], sizes = [1, 512], strides = [1, 1]} : vector<5x512xf32> to vector<1x512xf32>
    %6 = vector.broadcast %5 : vector<1x512xf32> to vector<8x512xf32>
    %7 = arith.addf %4, %6 : vector<8x512xf32>
    %cst_5 = arith.constant 0.000000e+00 : f32
    %8 = vector.broadcast %cst_5 : f32 to vector<8x512xf32>
    %9 = arith.maximumf %7, %8 : vector<8x512xf32>
    %10 = arith.truncf %9 : vector<8x512xf32> to vector<8x512xbf16>
    %c0_6 = arith.constant 0 : index
    %c0_7 = arith.constant 0 : index
    %11 = vector.load %arg3[%c0_6, %c0_7] : memref<512x256xbf16, #tpu.memory_space<vmem>>, vector<512x256xbf16>
    %cst_8 = arith.constant dense<0.000000e+00> : vector<8x256xf32>
    %12 = tpu.matmul %10, %11, %cst_8 {dimension_numbers = #tpu.dot_dimension_numbers<[1], [0], [0], [1], [0, 0, 1, 1], [], []>} : vector<8x512xbf16>, vector<512x256xbf16>, vector<8x256xf32> -> vector<8x256xf32>
    %13 = vector.extract_strided_slice %0 {offsets = [1, 0], sizes = [1, 256], strides = [1, 1]} : vector<5x512xf32> to vector<1x256xf32>
    %14 = vector.broadcast %13 : vector<1x256xf32> to vector<8x256xf32>
    %15 = arith.addf %12, %14 : vector<8x256xf32>
    %cst_9 = arith.constant 0.000000e+00 : f32
    %16 = vector.broadcast %cst_9 : f32 to vector<8x256xf32>
    %17 = arith.maximumf %15, %16 : vector<8x256xf32>
    %18 = arith.truncf %17 : vector<8x256xf32> to vector<8x256xbf16>
    %c0_10 = arith.constant 0 : index
    %c0_11 = arith.constant 0 : index
    %19 = vector.load %arg4[%c0_10, %c0_11] : memref<256x128xbf16, #tpu.memory_space<vmem>>, vector<256x128xbf16>
    %cst_12 = arith.constant dense<0.000000e+00> : vector<8x128xf32>
    %20 = tpu.matmul %18, %19, %cst_12 {dimension_numbers = #tpu.dot_dimension_numbers<[1], [0], [0], [1], [0, 0, 1, 1], [], []>} : vector<8x256xbf16>, vector<256x128xbf16>, vector<8x128xf32> -> vector<8x128xf32>
    %21 = vector.extract_strided_slice %0 {offsets = [2, 0], sizes = [1, 128], strides = [1, 1]} : vector<5x512xf32> to vector<1x128xf32>
    %22 = vector.broadcast %21 : vector<1x128xf32> to vector<8x128xf32>
    %23 = arith.addf %20, %22 : vector<8x128xf32>
    %cst_13 = arith.constant 0.000000e+00 : f32
    %24 = vector.broadcast %cst_13 : f32 to vector<8x128xf32>
    %25 = arith.maximumf %23, %24 : vector<8x128xf32>
    %26 = arith.truncf %25 : vector<8x128xf32> to vector<8x128xbf16>
    %c0_14 = arith.constant 0 : index
    %c0_15 = arith.constant 0 : index
    %27 = vector.load %arg5[%c0_14, %c0_15] : memref<128x64xbf16, #tpu.memory_space<vmem>>, vector<128x64xbf16>
    %cst_16 = arith.constant dense<0.000000e+00> : vector<8x64xf32>
    %28 = tpu.matmul %26, %27, %cst_16 {dimension_numbers = #tpu.dot_dimension_numbers<[1], [0], [0], [1], [0, 0, 1, 1], [], []>} : vector<8x128xbf16>, vector<128x64xbf16>, vector<8x64xf32> -> vector<8x64xf32>
    %29 = vector.extract_strided_slice %0 {offsets = [3, 0], sizes = [1, 64], strides = [1, 1]} : vector<5x512xf32> to vector<1x64xf32>
    %30 = vector.broadcast %29 : vector<1x64xf32> to vector<8x64xf32>
    %31 = arith.addf %28, %30 : vector<8x64xf32>
    %cst_17 = arith.constant 0.000000e+00 : f32
    %32 = vector.broadcast %cst_17 : f32 to vector<8x64xf32>
    %33 = arith.maximumf %31, %32 : vector<8x64xf32>
    %34 = arith.truncf %33 : vector<8x64xf32> to vector<8x64xbf16>
    %c0_18 = arith.constant 0 : index
    %c0_19 = arith.constant 0 : index
    %35 = vector.load %arg6[%c0_18, %c0_19] : memref<64x128xbf16, #tpu.memory_space<vmem>>, vector<64x128xbf16>
    %cst_20 = arith.constant dense<0.000000e+00> : vector<8x128xf32>
    %36 = tpu.matmul %34, %35, %cst_20 {dimension_numbers = #tpu.dot_dimension_numbers<[1], [0], [0], [1], [0, 0, 1, 1], [], []>} : vector<8x64xbf16>, vector<64x128xbf16>, vector<8x128xf32> -> vector<8x128xf32>
    %37 = vector.extract_strided_slice %0 {offsets = [4, 0], sizes = [1, 128], strides = [1, 1]} : vector<5x512xf32> to vector<1x128xf32>
    %38 = vector.broadcast %37 : vector<1x128xf32> to vector<8x128xf32>
    %39 = arith.addf %36, %38 : vector<8x128xf32>
    %40 = arith.truncf %39 : vector<8x128xf32> to vector<8x128xbf16>
    %c0_21 = arith.constant 0 : index
    %c0_22 = arith.constant 0 : index
    %41 = vector.load %arg8[%c0_21, %c0_22] : memref<8x128xbf16, #tpu.memory_space<vmem>>, vector<8x128xbf16>
    tpu.vector_store %arg8[%c0_21, %c0_22], %40 {strides = array<i32>} : memref<8x128xbf16, #tpu.memory_space<vmem>>, vector<8x128xbf16>,
    return
  }
  func.func @transform_0(%arg0: i32) -> (i32, i32) {
    %c0_i32 = arith.constant 0 : i32
    %c0_i32_0 = arith.constant 0 : i32
    return %arg0, %c0_i32 : i32, i32
  }
  func.func @transform_1(%arg0: i32) -> (i32, i32) {
    %c0_i32 = arith.constant 0 : i32
    %c0_i32_0 = arith.constant 0 : i32
    %c0_i32_1 = arith.constant 0 : i32
    return %c0_i32, %c0_i32_0 : i32, i32
  }
  func.func @transform_2(%arg0: i32) -> (i32, i32) {
    %c0_i32 = arith.constant 0 : i32
    %c0_i32_0 = arith.constant 0 : i32
    %c0_i32_1 = arith.constant 0 : i32
    return %c0_i32, %c0_i32_0 : i32, i32
  }
  func.func @transform_3(%arg0: i32) -> (i32, i32) {
    %c0_i32 = arith.constant 0 : i32
    %c0_i32_0 = arith.constant 0 : i32
    %c0_i32_1 = arith.constant 0 : i32
    return %c0_i32, %c0_i32_0 : i32, i32
  }
  func.func @transform_4(%arg0: i32) -> (i32, i32) {
    %c0_i32 = arith.constant 0 : i32
    %c0_i32_0 = arith.constant 0 : i32
    %c0_i32_1 = arith.constant 0 : i32
    return %c0_i32, %c0_i32_0 : i32, i32
  }
  func.func @transform_5(%arg0: i32) -> (i32, i32) {
    %c0_i32 = arith.constant 0 : i32
    %c0_i32_0 = arith.constant 0 : i32
    %c0_i32_1 = arith.constant 0 : i32
    return %c0_i32, %c0_i32_0 : i32, i32
  }
  func.func @transform_6(%arg0: i32) -> (i32, i32) {
    %c0_i32 = arith.constant 0 : i32
    %c0_i32_0 = arith.constant 0 : i32
    %c0_i32_1 = arith.constant 0 : i32
    return %c0_i32, %c0_i32_0 : i32, i32
  }
  func.func @transform_7(%arg0: i32) -> (i32, i32) {
    %c0_i32 = arith.constant 0 : i32
    %c0_i32_0 = arith.constant 0 : i32
    return %arg0, %c0_i32 : i32, i32
  }
}

</mosaic_0001>

<bundles_post_ra>
// kernel: net_forward.1
= control target key start
LH: loop header
LB: loop body
LE: loop exit
PB: predicated region body
PF: predicated region fallthrough
CT: control target
= control target key end

     0   :  { %12 = vsyncpa [#allocation3], 0  ;;  %s3245_s24 = smov [#allocation2]   ;;  %s3670_s0 = inlined_call_operand.vmem [shape: f32[8,784], index: 0, kind: input, shape index: {}]   ;;  %s3671_s1 = inlined_call_operand.hbm [shape: bf16[784,512], index: 1, kind: input, shape index: {}]   ;;  %s3672_s2 = inlined_call_operand.vmem [shape: bf16[512,256], index: 2, kind: input, shape index: {}]   ;;  %s3673_s3 = inlined_call_operand.vmem [shape: bf16[256,128], index: 3, kind: input, shape index: {}]   ;;  %s3674_s4 = inlined_call_operand.vmem [shape: bf16[128,64], index: 4, kind: input, shape index: {}]   ;;  %s3675_s5 = inlined_call_operand.vmem [shape: bf16[64,128], index: 5, kind: input, shape index: {}]   ;;  %s3676_s6 = inlined_call_operand.vmem [shape: f32[5,512], index: 6, kind: input, shape index: {}]   ;;  %s3677_s7 = inlined_call_operand.vmem [shape: bf16[8,128], index: 7, kind: output, shape index: {}]  }
   0x1   :  { %s20_s25 = sshll.u32 %s3245_s24, 4  ;;  %s21_s25 = int_to_ptr.vmem [resolvable:$true] %s20_s25 }
   0x2   :  { %s3231_s26 = scalar_lea.vmem %s21_s25, 25088  ;;  %p3236_p1 = scmp.lt.s32.totalorder %s21_s25, %s21_s25 }
   0x3   :  { %p3232_p0 = scmp.ne.s32.totalorder %s21_s25, %s3231_s26  ;;  %p3237_p2 = scmp.lt.s32.totalorder %s3231_s26, %s3231_s26 }
   0x5   :  { %p3238_p3 = por %p3237_p2, %p3236_p1 }
   0x7   :  { %p3239_p4 = pnand %p3238_p3, %p3232_p0 }
   0x9   :  { %3242 = shalt.err (!%p3239_p4)
}
   0xa   :  { %s3246_s27 = smov 256   ;;  %s3247_s28 = smov 16  }
   0xb   :  { %26 = dma.hbm_to_vmem [thread:$0]  %s3671_s1, 25088, %s21_s25, [#allocation3], %s3246_s27, %s3246_s27, %s3247_s28  }
   0xc   :  { %3243 = dma.done.wait [#allocation3], 25088  }
   0xd   :  { %3244 = vsyncadd [#allocation3], 4294942208  ;;  %v2805_v0 = vld [vmem:[#allocation2 + $0xe4] ss:$16 sps:$4 sm:$0xff]   ;;  %v2809_v2 = vld [vmem:[#allocation2 + $0xe0] ss:$16 sps:$4 sm:$0xff]  }
   0xe   :  { %v2807_v1 = vld [vmem:[#allocation2 + $0x2e4] ss:$16 sps:$4 sm:$0xff]   ;;  %1255 = vmatprep.subr.bf16.mxu0 %v2805_v0  ;;  %v2810_v3 = vld [vmem:[#allocation2 + $0x2e0] ss:$16 sps:$4 sm:$0xff]   ;;  %v46_v46 = vld [vmem:[%s3670_s0 + $0x8] sm:$0xff]  ;;  %vm1251_vm0 = vcmask 130048  }
   0xf   :  { %1296 = vmatprep.subr.bf16.mxu1 %v2807_v1  ;;  %v2811_v4 = vld [vmem:[#allocation2 + $0xc4] ss:$16 sps:$4 sm:$0xff]   ;;  %1256 = vmatpush1.bf16.msra.mxu0 %v2809_v2  ;;  %v2815_v6 = vld [vmem:[#allocation2 + $0xc0] ss:$16 sps:$4 sm:$0xff]   ;;  %v3297_v49 = vpack.c.bf16 %v46_v46, %v46_v46  ;;  %v48_v50 = vld [vmem:[%s3670_s0 + $0x18] sm:$0xff]  ;;  %vm3250_vm1 = vmmov 0  }
  0x10   :  { %1297 = vmatpush1.bf16.msra.mxu1 %v2810_v3  ;;  %v2813_v5 = vld [vmem:[#allocation2 + $0x2c4] ss:$16 sps:$4 sm:$0xff]   ;;  %1257 = vmatprep.subr.bf16.mxu0 %v2811_v4  ;;  %v2816_v7 = vld [vmem:[#allocation2 + $0x2c0] ss:$16 sps:$4 sm:$0xff]   ;;  %v3302_v52 = vpack.c.bf16 %v48_v50, %v48_v50  ;;  %vm2389_vm2 = vcmask 523264  }
  0x11   :  { %1298 = vmatprep.subr.bf16.mxu1 %v2813_v5  ;;  %v2817_v8 = vld [vmem:[#allocation2 + $0xa4] ss:$16 sps:$4 sm:$0xff]   ;;  %v2821_v10 = vld [vmem:[#allocation2 + $0xa0] ss:$16 sps:$4 sm:$0xff]   ;;  %1287 = vmatprep.mubr.bf16.mxu0 %v3297_v49 }
  0x12   :  { %v2819_v9 = vld [vmem:[#allocation2 + $0x2a4] ss:$16 sps:$4 sm:$0xff]   ;;  %v2822_v11 = vld [vmem:[#allocation2 + $0x2a0] ss:$16 sps:$4 sm:$0xff]   ;;  %1328 = vmatprep.mubr.bf16.mxu1 %v3302_v52 }
  0x13   :  { %1258 = vmatpush1.bf16.msra.mxu0 %v2815_v6  ;;  %v2823_v12 = vld [vmem:[#allocation2 + $0x84] ss:$16 sps:$4 sm:$0xff]   ;;  %v2827_v14 = vld [vmem:[#allocation2 + $0x80] ss:$16 sps:$4 sm:$0xff]  }
  0x14   :  { %1299 = vmatpush1.bf16.msra.mxu1 %v2816_v7  ;;  %1259 = vmatprep.subr.bf16.mxu0 %v2817_v8  ;;  %v2825_v13 = vld [vmem:[#allocation2 + $0x284] ss:$16 sps:$4 sm:$0xff]   ;;  %v2828_v15 = vld [vmem:[#allocation2 + $0x280] ss:$16 sps:$4 sm:$0xff]  }
  0x15   :  { %1300 = vmatprep.subr.bf16.mxu1 %v2819_v9  ;;  %v2829_v16 = vld [vmem:[#allocation2 + $0x64] ss:$16 sps:$4 sm:$0xff]   ;;  %v2833_v18 = vld [vmem:[#allocation2 + $0x60] ss:$16 sps:$4 sm:$0xff]  }
  0x16   :  { %v2831_v17 = vld [vmem:[#allocation2 + $0x264] ss:$16 sps:$4 sm:$0xff]   ;;  %v2834_v19 = vld [vmem:[#allocation2 + $0x260] ss:$16 sps:$4 sm:$0xff]  }
  0x17   :  { %1260 = vmatpush1.bf16.msra.mxu0 %v2821_v10  ;;  %v2835_v20 = vld [vmem:[#allocation2 + $0x44] ss:$16 sps:$4 sm:$0xff]   ;;  %v2839_v22 = vld [vmem:[#allocation2 + $0x40] ss:$16 sps:$4 sm:$0xff]  }
  0x18   :  { %1301 = vmatpush1.bf16.msra.mxu1 %v2822_v11  ;;  %1261 = vmatprep.subr.bf16.mxu0 %v2823_v12  ;;  %v2837_v21 = vld [vmem:[#allocation2 + $0x244] ss:$16 sps:$4 sm:$0xff]   ;;  %v2840_v23 = vld [vmem:[#allocation2 + $0x240] ss:$16 sps:$4 sm:$0xff]  }
  0x19   :  { %1302 = vmatprep.subr.bf16.mxu1 %v2825_v13  ;;  %v2841_v24 = vld [vmem:[#allocation2 + $0x24] ss:$16 sps:$4 sm:$0xff]   ;;  %v2845_v26 = vld [vmem:[#allocation2 + $0x20] ss:$16 sps:$4 sm:$0xff]   ;;  %v2912_v13 = vld [vmem:[#allocation2 + $0xec] ss:$16 sps:$4 sm:$0xff]  }
  0x1a   :  { %v2843_v25 = vld [vmem:[#allocation2 + $0x224] ss:$16 sps:$4 sm:$0xff]   ;;  %v2846_v27 = vld [vmem:[#allocation2 + $0x220] ss:$16 sps:$4 sm:$0xff]  }
  0x1b   :  { %1262 = vmatpush1.bf16.msra.mxu0 %v2827_v14  ;;  %v2847_v28 = vld [vmem:[#allocation2 + $0x4] ss:$16 sps:$4 sm:$0xff]   ;;  %v2851_v30 = vld [vmem:[#allocation2] ss:$16 sps:$4 sm:$0xff]  }
  0x1c   :  { %1303 = vmatpush1.bf16.msra.mxu1 %v2828_v15  ;;  %1263 = vmatprep.subr.bf16.mxu0 %v2829_v16  ;;  %v2849_v29 = vld [vmem:[#allocation2 + $0x204] ss:$16 sps:$4 sm:$0xff]   ;;  %v2852_v31 = vld [vmem:[#allocation2 + $0x200] ss:$16 sps:$4 sm:$0xff]   ;;  %v3248_v16 = vmov 0  }
  0x1d   :  { %1304 = vmatprep.subr.bf16.mxu1 %v2831_v17  ;;  %v2853_v32 = vld [vmem:[#allocation2 + $0x1e4] ss:$16 sps:$4 sm:$0xff]   ;;  %v2857_v34 = vld [vmem:[#allocation2 + $0x1e0] ss:$16 sps:$4 sm:$0xff]  }
  0x1e   :  { %v2855_v33 = vld [vmem:[#allocation2 + $0x3e4] ss:$16 sps:$4 sm:$0xff]   ;;  %v2858_v35 = vld [vmem:[#allocation2 + $0x3e0] ss:$16 sps:$4 sm:$0xff]  }
  0x1f   :  { %1264 = vmatpush1.bf16.msra.mxu0 %v2833_v18  ;;  %v2859_v36 = vld [vmem:[#allocation2 + $0x1c4] ss:$16 sps:$4 sm:$0xff]   ;;  %v2863_v38 = vld [vmem:[#allocation2 + $0x1c0] ss:$16 sps:$4 sm:$0xff]   ;;  %v2910_v18 = vld [vmem:[#allocation2 + $0xe8] ss:$16 sps:$4 sm:$0xff]  }
  0x20   :  { %1305 = vmatpush1.bf16.msra.mxu1 %v2834_v19  ;;  %1265 = vmatprep.subr.bf16.mxu0 %v2835_v20  ;;  %v2861_v37 = vld [vmem:[#allocation2 + $0x3c4] ss:$16 sps:$4 sm:$0xff]   ;;  %v2864_v39 = vld [vmem:[#allocation2 + $0x3c0] ss:$16 sps:$4 sm:$0xff]  }
  0x21   :  { %1306 = vmatprep.subr.bf16.mxu1 %v2837_v21  ;;  %v2865_v40 = vld [vmem:[#allocation2 + $0x1a4] ss:$16 sps:$4 sm:$0xff]   ;;  %v2869_v42 = vld [vmem:[#allocation2 + $0x1a0] ss:$16 sps:$4 sm:$0xff]   ;;  %v2918_v21 = vld [vmem:[#allocation2 + $0xcc] ss:$16 sps:$4 sm:$0xff]  }
  0x22   :  { %v2867_v41 = vld [vmem:[#allocation2 + $0x3a4] ss:$16 sps:$4 sm:$0xff]   ;;  %v2870_v43 = vld [vmem:[#allocation2 + $0x3a0] ss:$16 sps:$4 sm:$0xff]  }
  0x23   :  { %1266 = vmatpush1.bf16.msra.mxu0 %v2839_v22  ;;  %v2871_v44 = vld [vmem:[#allocation2 + $0x184] ss:$16 sps:$4 sm:$0xff]   ;;  %v2875_v47 = vld [vmem:[#allocation2 + $0x180] ss:$16 sps:$4 sm:$0xff]  }
  0x24   :  { %1307 = vmatpush1.bf16.msra.mxu1 %v2840_v23  ;;  %1267 = vmatprep.subr.bf16.mxu0 %v2841_v24  ;;  %v2873_v45 = vld [vmem:[#allocation2 + $0x384] ss:$16 sps:$4 sm:$0xff]   ;;  %v2876_v48 = vld [vmem:[#allocation2 + $0x380] ss:$16 sps:$4 sm:$0xff]   ;;  %v2916_v23 = vld [vmem:[#allocation2 + $0xc8] ss:$16 sps:$4 sm:$0xff]  }
  0x25   :  { %1308 = vmatprep.subr.bf16.mxu1 %v2843_v25  ;;  %v2877_v51 = vld [vmem:[#allocation2 + $0x164] ss:$16 sps:$4 sm:$0xff]   ;;  %v2881_v54 = vld [vmem:[#allocation2 + $0x160] ss:$16 sps:$4 sm:$0xff]   ;;  %v2924_v25 = vld [vmem:[#allocation2 + $0xac] ss:$16 sps:$4 sm:$0xff]  }
  0x26   :  { %v2879_v53 = vld [vmem:[#allocation2 + $0x364] ss:$16 sps:$4 sm:$0xff]   ;;  %v2882_v55 = vld [vmem:[#allocation2 + $0x360] ss:$16 sps:$4 sm:$0xff]  }
  0x27   :  { %1268 = vmatpush1.bf16.msra.mxu0 %v2845_v26  ;;  %v2883_v56 = vld [vmem:[#allocation2 + $0x144] ss:$16 sps:$4 sm:$0xff]   ;;  %v2887_v58 = vld [vmem:[#allocation2 + $0x140] ss:$16 sps:$4 sm:$0xff]  }
  0x28   :  { %1309 = vmatpush1.bf16.msra.mxu1 %v2846_v27  ;;  %1269 = vmatprep.subr.bf16.mxu0 %v2847_v28  ;;  %v2885_v57 = vld [vmem:[#allocation2 + $0x344] ss:$16 sps:$4 sm:$0xff]   ;;  %v2888_v59 = vld [vmem:[#allocation2 + $0x340] ss:$16 sps:$4 sm:$0xff]   ;;  %v2922_v27 = vld [vmem:[#allocation2 + $0xa8] ss:$16 sps:$4 sm:$0xff]  }
  0x29   :  { %1310 = vmatprep.subr.bf16.mxu1 %v2849_v29  ;;  %v2889_v60 = vld [vmem:[#allocation2 + $0x124] ss:$16 sps:$4 sm:$0xff]   ;;  %v2893_v62 = vld [vmem:[#allocation2 + $0x120] ss:$16 sps:$4 sm:$0xff]   ;;  %v2930_v29 = vld [vmem:[#allocation2 + $0x8c] ss:$16 sps:$4 sm:$0xff]  }
  0x2a   :  { %v2891_v61 = vld [vmem:[#allocation2 + $0x324] ss:$16 sps:$4 sm:$0xff]   ;;  %v2894_v63 = vld [vmem:[#allocation2 + $0x320] ss:$16 sps:$4 sm:$0xff]  }
  0x2b   :  { %1270 = vmatpush1.bf16.msra.mxu0 %v2851_v30  ;;  %v2895_v0 = vld [vmem:[#allocation2 + $0x104] ss:$16 sps:$4 sm:$0xff]   ;;  %v2899_v2 = vld [vmem:[#allocation2 + $0x100] ss:$16 sps:$4 sm:$0xff]  }
  0x2c   :  { %1311 = vmatpush1.bf16.msra.mxu1 %v2852_v31  ;;  %1271 = vmatprep.subr.bf16.mxu0 %v2853_v32  ;;  %v2897_v1 = vld [vmem:[#allocation2 + $0x304] ss:$16 sps:$4 sm:$0xff]   ;;  %v2900_v3 = vld [vmem:[#allocation2 + $0x300] ss:$16 sps:$4 sm:$0xff]   ;;  %v2928_v31 = vld [vmem:[#allocation2 + $0x88] ss:$16 sps:$4 sm:$0xff]  }
  0x2d   :  { %1312 = vmatprep.subr.bf16.mxu1 %v2855_v33  ;;  %v45_v4 = vld [vmem:[%s3670_s0] sm:$0xff]  ;;  %v47_v5 = vld [vmem:[%s3670_s0 + $0x10] sm:$0xff]  ;;  %v2936_v33 = vld [vmem:[#allocation2 + $0x6c] ss:$16 sps:$4 sm:$0xff]  }
  0x2e   :  { %v2903_v6 = vld [vmem:[#allocation2 + $0x4e4] ss:$16 sps:$4 sm:$0xff]   ;;  %v3312_v8 = vpack.c.bf16 %v45_v4, %v45_v4  ;;  %v3314_v9 = vpack.c.bf16 %v47_v5, %v47_v5  ;;  %v2901_v10 = vld [vmem:[#allocation2 + $0x4e0] ss:$16 sps:$4 sm:$0xff]   ;;  %v2984_v4 = vld [vmem:[#allocation2 + $0x16c] ss:$16 sps:$4 sm:$0xff]  }
  0x2f   :  { %1272 = vmatpush2.bf16.msra.mxu0 %v2857_v34  ;;  %v2906_v7 = vld [vmem:[#allocation2 + $0x604] ss:$16 sps:$4 sm:$0xff]   ;;  %v2904_v11 = vld [vmem:[#allocation2 + $0x600] ss:$16 sps:$4 sm:$0xff]  }
  0x30   :  { %1313 = vmatpush2.bf16.msra.mxu1 %v2858_v35  ;;  %1273 = vmatprep.subr.bf16.mxu0 %v2859_v36  ;;  %v2909_v12 = vld [vmem:[#allocation2 + $0x4c4] ss:$16 sps:$4 sm:$0xff]   ;;  %v2907_v14 = vld [vmem:[#allocation2 + $0x4c0] ss:$16 sps:$4 sm:$0xff]   ;;  %v50_v35 = vld [vmem:[%s3670_s0 + $0x28] sm:$0xff] }
  0x31   :  { %1314 = vmatprep.subr.bf16.mxu1 %v2861_v37  ;;  %v51_v15 = vld [vmem:[%s3670_s0 + $0x30] sm:$0xff]  ;;  %v3330_v36 = vpack.c.bf16 %v50_v35, %v50_v35  ;;  %v2934_v37 = vld [vmem:[#allocation2 + $0x68] ss:$16 sps:$4 sm:$0xff]   ;;  %v3023_v35 = vld [vmem:[#allocation2 + $0x26c] ss:$16 sps:$4 sm:$0xff]  }
  0x32   :  { %v2915_v17 = vld [vmem:[#allocation2 + $0x4a4] ss:$16 sps:$4 sm:$0xff]   ;;  %v3322_v19 = vpack.c.bf16 %v51_v15, %v51_v15  ;;  %v2913_v20 = vld [vmem:[#allocation2 + $0x4a0] ss:$16 sps:$4 sm:$0xff]  }
  0x33   :  { %1274 = vmatpush2.bf16.msra.mxu0 %v2863_v38  ;;  %v2921_v22 = vld [vmem:[#allocation2 + $0x484] ss:$16 sps:$4 sm:$0xff]   ;;  %v2919_v24 = vld [vmem:[#allocation2 + $0x480] ss:$16 sps:$4 sm:$0xff]  }
  0x34   :  { %1315 = vmatpush2.bf16.msra.mxu1 %v2864_v39  ;;  %1275 = vmatprep.subr.bf16.mxu0 %v2865_v40  ;;  %v2927_v26 = vld [vmem:[#allocation2 + $0x464] ss:$16 sps:$4 sm:$0xff]   ;;  %v2925_v28 = vld [vmem:[#allocation2 + $0x460] ss:$16 sps:$4 sm:$0xff]   ;;  %v2942_v39 = vld [vmem:[#allocation2 + $0x4c] ss:$16 sps:$4 sm:$0xff]  }
  0x35   :  { %1316 = vmatprep.subr.bf16.mxu1 %v2867_v41  ;;  %v2933_v30 = vld [vmem:[#allocation2 + $0x444] ss:$16 sps:$4 sm:$0xff]   ;;  %v2931_v32 = vld [vmem:[#allocation2 + $0x440] ss:$16 sps:$4 sm:$0xff]   ;;  %v2940_v41 = vld [vmem:[#allocation2 + $0x48] ss:$16 sps:$4 sm:$0xff]  }
  0x36   :  { %v2939_v34 = vld [vmem:[#allocation2 + $0x424] ss:$16 sps:$4 sm:$0xff]   ;;  %v2937_v38 = vld [vmem:[#allocation2 + $0x420] ss:$16 sps:$4 sm:$0xff]  }
  0x37   :  { %1276 = vmatpush2.bf16.msra.mxu0 %v2869_v42  ;;  %v2945_v40 = vld [vmem:[#allocation2 + $0x404] ss:$16 sps:$4 sm:$0xff]   ;;  %v2943_v42 = vld [vmem:[#allocation2 + $0x400] ss:$16 sps:$4 sm:$0xff]  }
  0x38   :  { %1317 = vmatpush2.bf16.msra.mxu1 %v2870_v43  ;;  %1277 = vmatprep.subr.bf16.mxu0 %v2871_v44  ;;  %v2948_v43 = vld [vmem:[#allocation2 + $0x2c] ss:$16 sps:$4 sm:$0xff]   ;;  %v2951_v44 = vld [vmem:[#allocation2 + $0x5e4] ss:$16 sps:$4 sm:$0xff]   ;;  %v2949_v46 = vld [vmem:[#allocation2 + $0x5e0] ss:$16 sps:$4 sm:$0xff]  }
  0x39   :  { %1318 = vmatprep.subr.bf16.mxu1 %v2873_v45  ;;  %v2946_v45 = vld [vmem:[#allocation2 + $0x28] ss:$16 sps:$4 sm:$0xff]   ;;  %v2955_v50 = vld [vmem:[#allocation2 + $0x5c0] ss:$16 sps:$4 sm:$0xff]   ;;  %v2987_v5 = vld [vmem:[#allocation2 + $0x524] ss:$16 sps:$4 sm:$0xff]  }
  0x3a   :  { %v49_v15 = vld [vmem:[%s3670_s0 + $0x20] sm:$0xff] }
  0x3b   :  { %1278 = vmatpush2.bf16.msra.mxu0 %v2875_v47  ;;  %v2954_v47 = vld [vmem:[#allocation2 + $0xc] ss:$16 sps:$4 sm:$0xff]  }
  0x3c   :  { %1319 = vmatpush2.bf16.msra.mxu1 %v2876_v48  ;;  %1279 = vmatprep.subr.bf16.mxu0 %v2877_v51  ;;  %v2957_v48 = vld [vmem:[#allocation2 + $0x5c4] ss:$16 sps:$4 sm:$0xff]   ;;  %v2960_v51 = vld [vmem:[#allocation2 + $0x1ec] ss:$16 sps:$4 sm:$0xff]  }
  0x3d   :  { %1320 = vmatprep.subr.bf16.mxu1 %v2879_v53  ;;  %v2963_v53 = vld [vmem:[#allocation2 + $0x5a4] ss:$16 sps:$4 sm:$0xff]  }
  0x3f   :  { %1280 = vmatpush2.bf16.msra.mxu0 %v2881_v54  ;;  %v2958_v54 = vld [vmem:[#allocation2 + $0x1e8] ss:$16 sps:$4 sm:$0xff]  }
  0x40   :  { %1321 = vmatpush2.bf16.msra.mxu1 %v2882_v55  ;;  %1281 = vmatprep.subr.bf16.mxu0 %v2883_v56  ;;  %v2961_v55 = vld [vmem:[#allocation2 + $0x5a0] ss:$16 sps:$4 sm:$0xff]   ;;  %v2966_v56 = vld [vmem:[#allocation2 + $0x1cc] ss:$16 sps:$4 sm:$0xff]  }
  0x41   :  { %1322 = vmatprep.subr.bf16.mxu1 %v2885_v57  ;;  %v2969_v57 = vld [vmem:[#allocation2 + $0x584] ss:$16 sps:$4 sm:$0xff]  }
  0x43   :  { %1282 = vmatpush2.bf16.msra.mxu0 %v2887_v58  ;;  %v2964_v58 = vld [vmem:[#allocation2 + $0x1c8] ss:$16 sps:$4 sm:$0xff]  }
  0x44   :  { %1323 = vmatpush2.bf16.msra.mxu1 %v2888_v59  ;;  %1283 = vmatprep.subr.bf16.mxu0 %v2889_v60  ;;  %v2967_v59 = vld [vmem:[#allocation2 + $0x580] ss:$16 sps:$4 sm:$0xff]   ;;  %v2972_v60 = vld [vmem:[#allocation2 + $0x1ac] ss:$16 sps:$4 sm:$0xff]  }
  0x45   :  { %1324 = vmatprep.subr.bf16.mxu1 %v2891_v61  ;;  %v2975_v61 = vld [vmem:[#allocation2 + $0x564] ss:$16 sps:$4 sm:$0xff]  }
  0x47   :  { %1284 = vmatpush2.bf16.msra.mxu0 %v2893_v62  ;;  %v2970_v62 = vld [vmem:[#allocation2 + $0x1a8] ss:$16 sps:$4 sm:$0xff]  }
  0x48   :  { %1325 = vmatpush2.bf16.msra.mxu1 %v2894_v63  ;;  %1285 = vmatprep.subr.bf16.mxu0 %v2895_v0  ;;  %v2973_v63 = vld [vmem:[#allocation2 + $0x560] ss:$16 sps:$4 sm:$0xff]   ;;  %v2978_v0 = vld [vmem:[#allocation2 + $0x18c] ss:$16 sps:$4 sm:$0xff]  }
  0x49   :  { %1326 = vmatprep.subr.bf16.mxu1 %v2897_v1  ;;  %v2981_v1 = vld [vmem:[#allocation2 + $0x544] ss:$16 sps:$4 sm:$0xff]  }
  0x4b   :  { %1286 = vmatpush2.bf16.msra.mxu0 %v2899_v2  ;;  %v2976_v2 = vld [vmem:[#allocation2 + $0x188] ss:$16 sps:$4 sm:$0xff]  }
  0x4c   :  { %1327 = vmatpush2.bf16.msra.mxu1 %v2900_v3  ;;  %1337 = vmatprep.subr.bf16.mxu0 %v2903_v6  ;;  %v2979_v3 = vld [vmem:[#allocation2 + $0x540] ss:$16 sps:$4 sm:$0xff]   ;;  %v2982_v6 = vld [vmem:[#allocation2 + $0x168] ss:$16 sps:$4 sm:$0xff]  }
  0x4d   :  { %1392 = vmatprep.subr.bf16.mxu1 %v2906_v7  ;;  %v2985_v7 = vld [vmem:[#allocation2 + $0x520] ss:$16 sps:$4 sm:$0xff]  }
  0x4e   :  { %1288 = vmatmul.mubr.bf16.vlgmr.msra.gmra.mxu0 %v3312_v8 }
  0x4f   :  { %1329 = vmatmul.mubr.bf16.vlgmr.msra.gmra.mxu1 %v3314_v9  ;;  %1338 = vmatpush1.bf16.msra.mxu0 %v2901_v10  ;;  %v2990_v10 = vld [vmem:[#allocation2 + $0x14c] ss:$16 sps:$4 sm:$0xff]  }
  0x50   :  { %1393 = vmatpush1.bf16.msra.mxu1 %v2904_v11  ;;  %1339 = vmatprep.subr.bf16.mxu0 %v2909_v12  ;;  %v2993_v11 = vld [vmem:[#allocation2 + $0x504] ss:$16 sps:$4 sm:$0xff]   ;;  %v2988_v12 = vld [vmem:[#allocation2 + $0x148] ss:$16 sps:$4 sm:$0xff]  }
  0x51   :  { %1410 = vmatprep.mubr.bf16.mxu1 %v3248_v16  ;;  %1419 = vmatprep.subr.bf16.mxu1 %v2912_v13  ;;  %v2991_v13 = vld [vmem:[#allocation2 + $0x500] ss:$16 sps:$4 sm:$0xff]  }
  0x52   :  { %1369 = vmatprep.mubr.bf16.mxu0 %v3330_v36 }
  0x53   :  { %1340 = vmatpush1.bf16.msra.mxu0 %v2907_v14  ;;  %v2996_v14 = vld [vmem:[#allocation2 + $0x12c] ss:$16 sps:$4 sm:$0xff]  }
  0x54   :  { %1341 = vmatprep.subr.bf16.mxu0 %v2915_v17  ;;  %v2999_v17 = vld [vmem:[#allocation2 + $0x2ec] ss:$16 sps:$4 sm:$0xff]  }
  0x57   :  { %2636 = vmatmul.mubr.msk.bf16.vlgmr.msra.gmra.mxu1 %vm1251_vm0, %v3322_v19  ;;  %1342 = vmatpush1.bf16.msra.mxu0 %v2913_v20  ;;  %v3336_v20 = vpack.c.bf16 %v49_v15, %v49_v15  ;;  %v3086_v15 = vld [vmem:[#allocation2 + $0x54c] ss:$16 sps:$4 sm:$0xff]  }
  0x58   :  { %1420 = vmatpush1.bf16.msra.mxu1 %v2910_v18  ;;  %1343 = vmatprep.subr.bf16.mxu0 %v2921_v22  ;;  %v2994_v18 = vld [vmem:[#allocation2 + $0x128] ss:$16 sps:$4 sm:$0xff]   ;;  %v3002_v22 = vld [vmem:[#allocation2 + $0x10c] ss:$16 sps:$4 sm:$0xff]  }
  0x59   :  { %1421 = vmatprep.subr.bf16.mxu1 %v2918_v21  ;;  %1451 = vmatprep.mubr.bf16.mxu1 %v3297_v49  ;;  %v2952_v49 = vld [vmem:[#allocation2 + $0x8] ss:$16 sps:$4 sm:$0xff]  }
  0x5a   :  { %v2997_v21 = vld [vmem:[#allocation2 + $0x2e8] ss:$16 sps:$4 sm:$0xff]  }
  0x5b   :  { %1344 = vmatpush1.bf16.msra.mxu0 %v2919_v24  ;;  %v3000_v24 = vld [vmem:[#allocation2 + $0x108] ss:$16 sps:$4 sm:$0xff]  }
  0x5c   :  { %1422 = vmatpush1.bf16.msra.mxu1 %v2916_v23  ;;  %1345 = vmatprep.subr.bf16.mxu0 %v2927_v26  ;;  %v3005_v23 = vld [vmem:[#allocation2 + $0x2cc] ss:$16 sps:$4 sm:$0xff]  }
  0x5d   :  { %1423 = vmatprep.subr.bf16.mxu1 %v2924_v25  ;;  %v3003_v25 = vld [vmem:[#allocation2 + $0x2c8] ss:$16 sps:$4 sm:$0xff]   ;;  %v3008_v26 = vld [vmem:[#allocation2 + $0x4ec] ss:$16 sps:$4 sm:$0xff]  }
  0x5f   :  { %1346 = vmatpush1.bf16.msra.mxu0 %v2925_v28  ;;  %v3006_v28 = vld [vmem:[#allocation2 + $0x4e8] ss:$16 sps:$4 sm:$0xff]  }
  0x60   :  { %1424 = vmatpush1.bf16.msra.mxu1 %v2922_v27  ;;  %1347 = vmatprep.subr.bf16.mxu0 %v2933_v30  ;;  %v3011_v27 = vld [vmem:[#allocation2 + $0x2ac] ss:$16 sps:$4 sm:$0xff]  }
  0x61   :  { %1425 = vmatprep.subr.bf16.mxu1 %v2930_v29  ;;  %v3009_v29 = vld [vmem:[#allocation2 + $0x2a8] ss:$16 sps:$4 sm:$0xff]   ;;  %v3014_v30 = vld [vmem:[#allocation2 + $0x4cc] ss:$16 sps:$4 sm:$0xff]  }
  0x63   :  { %1348 = vmatpush1.bf16.msra.mxu0 %v2931_v32  ;;  %v3012_v32 = vld [vmem:[#allocation2 + $0x4c8] ss:$16 sps:$4 sm:$0xff]  }
  0x64   :  { %1426 = vmatpush1.bf16.msra.mxu1 %v2928_v31  ;;  %1349 = vmatprep.subr.bf16.mxu0 %v2939_v34  ;;  %v3017_v31 = vld [vmem:[#allocation2 + $0x28c] ss:$16 sps:$4 sm:$0xff]  }
  0x65   :  { %1427 = vmatprep.subr.bf16.mxu1 %v2936_v33  ;;  %v3015_v33 = vld [vmem:[#allocation2 + $0x288] ss:$16 sps:$4 sm:$0xff]   ;;  %v3020_v34 = vld [vmem:[#allocation2 + $0x4ac] ss:$16 sps:$4 sm:$0xff]  }
  0x67   :  { %1350 = vmatpush1.bf16.msra.mxu0 %v2937_v38  ;;  %v3026_v38 = vld [vmem:[#allocation2 + $0x48c] ss:$16 sps:$4 sm:$0xff]  }
  0x68   :  { %1428 = vmatpush1.bf16.msra.mxu1 %v2934_v37  ;;  %1351 = vmatprep.subr.bf16.mxu0 %v2945_v40  ;;  %v3018_v37 = vld [vmem:[#allocation2 + $0x4a8] ss:$16 sps:$4 sm:$0xff]  }
  0x69   :  { %1429 = vmatprep.subr.bf16.mxu1 %v2942_v39  ;;  %v3029_v39 = vld [vmem:[#allocation2 + $0x24c] ss:$16 sps:$4 sm:$0xff]   ;;  %v3024_v40 = vld [vmem:[#allocation2 + $0x488] ss:$16 sps:$4 sm:$0xff]  }
  0x6b   :  { %1352 = vmatpush1.bf16.msra.mxu0 %v2943_v42  ;;  %v3035_v42 = vld [vmem:[#allocation2 + $0x22c] ss:$16 sps:$4 sm:$0xff]  }
  0x6c   :  { %1430 = vmatpush1.bf16.msra.mxu1 %v2940_v41  ;;  %1353 = vmatprep.subr.bf16.mxu0 %v2951_v44  ;;  %v3032_v41 = vld [vmem:[#allocation2 + $0x46c] ss:$16 sps:$4 sm:$0xff]   ;;  %v3033_v44 = vld [vmem:[#allocation2 + $0x228] ss:$16 sps:$4 sm:$0xff]  }
  0x6d   :  { %1431 = vmatprep.subr.bf16.mxu1 %v2948_v43  ;;  %v3030_v43 = vld [vmem:[#allocation2 + $0x468] ss:$16 sps:$4 sm:$0xff]  }
  0x6f   :  { %1354 = vmatpush2.bf16.msra.mxu0 %v2949_v46  ;;  %v3036_v46 = vld [vmem:[#allocation2 + $0x448] ss:$16 sps:$4 sm:$0xff]  }
  0x70   :  { %1432 = vmatpush1.bf16.msra.mxu1 %v2946_v45  ;;  %1355 = vmatprep.subr.bf16.mxu0 %v2957_v48  ;;  %v3041_v45 = vld [vmem:[#allocation2 + $0x20c] ss:$16 sps:$4 sm:$0xff]  }
  0x71   :  { %1433 = vmatprep.subr.bf16.mxu1 %v2954_v47  ;;  %v3039_v47 = vld [vmem:[#allocation2 + $0x208] ss:$16 sps:$4 sm:$0xff]   ;;  %v3044_v48 = vld [vmem:[#allocation2 + $0x42c] ss:$16 sps:$4 sm:$0xff]  }
  0x73   :  { %1356 = vmatpush2.bf16.msra.mxu0 %v2955_v50  ;;  %v3042_v50 = vld [vmem:[#allocation2 + $0x428] ss:$16 sps:$4 sm:$0xff]  }
  0x74   :  { %1434 = vmatpush1.bf16.msra.mxu1 %v2952_v49  ;;  %1357 = vmatprep.subr.bf16.mxu0 %v2963_v53  ;;  %v3047_v49 = vld [vmem:[#allocation2 + $0x3ec] ss:$16 sps:$4 sm:$0xff]  }
  0x75   :  { %1435 = vmatprep.subr.bf16.mxu1 %v2960_v51  ;;  %v3045_v51 = vld [vmem:[#allocation2 + $0x3e8] ss:$16 sps:$4 sm:$0xff]   ;;  %v3050_v53 = vld [vmem:[#allocation2 + $0x40c] ss:$16 sps:$4 sm:$0xff]  }
  0x77   :  { %1358 = vmatpush2.bf16.msra.mxu0 %v2961_v55  ;;  %v3048_v55 = vld [vmem:[#allocation2 + $0x408] ss:$16 sps:$4 sm:$0xff]  }
  0x78   :  { %1436 = vmatpush2.bf16.msra.mxu1 %v2958_v54  ;;  %1359 = vmatprep.subr.bf16.mxu0 %v2969_v57  ;;  %v3053_v54 = vld [vmem:[#allocation2 + $0x3cc] ss:$16 sps:$4 sm:$0xff]  }
  0x79   :  { %1437 = vmatprep.subr.bf16.mxu1 %v2966_v56  ;;  %v3051_v56 = vld [vmem:[#allocation2 + $0x3c8] ss:$16 sps:$4 sm:$0xff]   ;;  %v3056_v57 = vld [vmem:[#allocation2 + $0x5ec] ss:$16 sps:$4 sm:$0xff]  }
  0x7b   :  { %1360 = vmatpush2.bf16.msra.mxu0 %v2967_v59  ;;  %v3054_v59 = vld [vmem:[#allocation2 + $0x5e8] ss:$16 sps:$4 sm:$0xff]  }
  0x7c   :  { %1438 = vmatpush2.bf16.msra.mxu1 %v2964_v58  ;;  %1361 = vmatprep.subr.bf16.mxu0 %v2975_v61  ;;  %v3059_v58 = vld [vmem:[#allocation2 + $0x3ac] ss:$16 sps:$4 sm:$0xff]  }
  0x7d   :  { %1439 = vmatprep.subr.bf16.mxu1 %v2972_v60  ;;  %v3057_v60 = vld [vmem:[#allocation2 + $0x3a8] ss:$16 sps:$4 sm:$0xff]   ;;  %v3062_v61 = vld [vmem:[#allocation2 + $0x5cc] ss:$16 sps:$4 sm:$0xff]  }
  0x7f   :  { %1362 = vmatpush2.bf16.msra.mxu0 %v2973_v63  ;;  %v3060_v63 = vld [vmem:[#allocation2 + $0x5c8] ss:$16 sps:$4 sm:$0xff]  }
  0x80   :  { %1440 = vmatpush2.bf16.msra.mxu1 %v2970_v62  ;;  %1363 = vmatprep.subr.bf16.mxu0 %v2981_v1  ;;  %v3065_v62 = vld [vmem:[#allocation2 + $0x38c] ss:$16 sps:$4 sm:$0xff]  }
  0x81   :  { %1441 = vmatprep.subr.bf16.mxu1 %v2978_v0  ;;  %v3063_v0 = vld [vmem:[#allocation2 + $0x388] ss:$16 sps:$4 sm:$0xff]   ;;  %v3068_v1 = vld [vmem:[#allocation2 + $0x5ac] ss:$16 sps:$4 sm:$0xff]  }
  0x83   :  { %1364 = vmatpush2.bf16.msra.mxu0 %v2979_v3  ;;  %v3066_v3 = vld [vmem:[#allocation2 + $0x5a8] ss:$16 sps:$4 sm:$0xff]  }
  0x84   :  { %1442 = vmatpush2.bf16.msra.mxu1 %v2976_v2  ;;  %1365 = vmatprep.subr.bf16.mxu0 %v2987_v5  ;;  %v3071_v2 = vld [vmem:[#allocation2 + $0x36c] ss:$16 sps:$4 sm:$0xff]  }
  0x85   :  { %1443 = vmatprep.subr.bf16.mxu1 %v2984_v4  ;;  %v3069_v4 = vld [vmem:[#allocation2 + $0x368] ss:$16 sps:$4 sm:$0xff]   ;;  %v3074_v5 = vld [vmem:[#allocation2 + $0x58c] ss:$16 sps:$4 sm:$0xff]  }
  0x87   :  { %1366 = vmatpush2.bf16.msra.mxu0 %v2985_v7  ;;  %v3072_v7 = vld [vmem:[#allocation2 + $0x588] ss:$16 sps:$4 sm:$0xff]  }
  0x88   :  { %1444 = vmatpush2.bf16.msra.mxu1 %v2982_v6  ;;  %1367 = vmatprep.subr.bf16.mxu0 %v2993_v11  ;;  %v3077_v6 = vld [vmem:[#allocation2 + $0x34c] ss:$16 sps:$4 sm:$0xff]  }
  0x89   :  { %1445 = vmatprep.subr.bf16.mxu1 %v2990_v10  ;;  %v3075_v10 = vld [vmem:[#allocation2 + $0x348] ss:$16 sps:$4 sm:$0xff]   ;;  %v3080_v11 = vld [vmem:[#allocation2 + $0x56c] ss:$16 sps:$4 sm:$0xff]  }
  0x8b   :  { %1368 = vmatpush2.bf16.msra.mxu0 %v2991_v13  ;;  %v3078_v13 = vld [vmem:[#allocation2 + $0x568] ss:$16 sps:$4 sm:$0xff]  }
  0x8c   :  { %1446 = vmatpush2.bf16.msra.mxu1 %v2988_v12  ;;  %1460 = vmatprep.subr.bf16.mxu0 %v2999_v17  ;;  %v3083_v12 = vld [vmem:[#allocation2 + $0x32c] ss:$16 sps:$4 sm:$0xff]  }
  0x8d   :  { %1447 = vmatprep.subr.bf16.mxu1 %v2996_v14  ;;  %v3081_v14 = vld [vmem:[#allocation2 + $0x328] ss:$16 sps:$4 sm:$0xff]   ;;  %v3089_v17 = vld [vmem:[#allocation2 + $0x30c] ss:$16 sps:$4 sm:$0xff]  }
  0x8e   :  { %1370 = vmatmul.mubr.bf16.vlgmr.msra.gmra.mxu0 %v3336_v20 }
  0x8f   :  { %1461 = vmatpush1.bf16.msra.mxu0 %v2997_v21  ;;  %1492 = vmatprep.mubr.bf16.mxu0 %v3302_v52  ;;  %v3021_v52 = vld [vmem:[#allocation2 + $0x268] ss:$16 sps:$4 sm:$0xff]  }
  0x90   :  { %1448 = vmatpush2.bf16.msra.mxu1 %v2994_v18  ;;  %1462 = vmatprep.subr.bf16.mxu0 %v3005_v23  ;;  %v3084_v18 = vld [vmem:[#allocation2 + $0x548] ss:$16 sps:$4 sm:$0xff]   ;;  %v3101_v23 = vld [vmem:[%s3672_s2 + $0x74] ss:$8 sps:$4 sm:$0xff]  }
  0x91   :  { %1449 = vmatprep.subr.bf16.mxu1 %v3002_v22  ;;  %v3087_v21 = vld [vmem:[#allocation2 + $0x308] ss:$16 sps:$4 sm:$0xff]   ;;  %v3092_v22 = vld [vmem:[#allocation2 + $0x52c] ss:$16 sps:$4 sm:$0xff]  }
  0x93   :  { %1463 = vmatpush1.bf16.msra.mxu0 %v3003_v25  ;;  %v3099_v25 = vld [vmem:[%s3672_s2 + $0x70] ss:$8 sps:$4 sm:$0xff]  }
  0x94   :  { %1450 = vmatpush2.bf16.msra.mxu1 %v3000_v24  ;;  %1464 = vmatprep.subr.bf16.mxu0 %v3011_v27  ;;  %v3090_v24 = vld [vmem:[#allocation2 + $0x528] ss:$16 sps:$4 sm:$0xff]   ;;  %v3104_v27 = vld [vmem:[%s3672_s2 + $0x64] ss:$8 sps:$4 sm:$0xff]  }
  0x95   :  { %1501 = vmatprep.subr.bf16.mxu1 %v3008_v26  ;;  %v3095_v26 = vld [vmem:[#allocation2 + $0x50c] ss:$16 sps:$4 sm:$0xff]  }
  0x97   :  { %1452 = vmatmul.mubr.bf16.vlgmr.msra.gmra.mxu1 %v3312_v8  ;;  %1465 = vmatpush1.bf16.msra.mxu0 %v3009_v29  ;;  %v3027_v8 = vld [vmem:[#allocation2 + $0x248] ss:$16 sps:$4 sm:$0xff]  }
  0x98   :  { %1502 = vmatpush1.bf16.msra.mxu1 %v3006_v28  ;;  %1466 = vmatprep.subr.bf16.mxu0 %v3017_v31  ;;  %v3093_v28 = vld [vmem:[#allocation2 + $0x508] ss:$16 sps:$4 sm:$0xff]   ;;  %v3107_v31 = vld [vmem:[%s3672_s2 + $0x54] ss:$8 sps:$4 sm:$0xff]  }
  0x99   :  { %1503 = vmatprep.subr.bf16.mxu1 %v3014_v30  ;;  %1533 = vmatprep.mubr.bf16.mxu1 %v3330_v36  ;;  %v3038_v36 = vld [vmem:[#allocation2 + $0x44c] ss:$16 sps:$4 sm:$0xff]   ;;  %v3102_v29 = vld [vmem:[%s3672_s2 + $0x60] ss:$8 sps:$4 sm:$0xff]  }
  0x9a   :  { %v3098_v30 = vld [vmem:[#allocation2 + $0x60c] ss:$16 sps:$4 sm:$0xff]  }
  0x9b   :  { %1467 = vmatpush1.bf16.msra.mxu0 %v3015_v33  ;;  %v3110_v33 = vld [vmem:[%s3672_s2 + $0x44] ss:$8 sps:$4 sm:$0xff]  }
  0x9c   :  { %1504 = vmatpush1.bf16.msra.mxu1 %v3012_v32  ;;  %1468 = vmatprep.subr.bf16.mxu0 %v3023_v35  ;;  %v3096_v32 = vld [vmem:[#allocation2 + $0x608] ss:$16 sps:$4 sm:$0xff]   ;;  %v3113_v35 = vld [vmem:[%s3672_s2 + $0x34] ss:$8 sps:$4 sm:$0xff]  }
  0x9d   :  { %1505 = vmatprep.subr.bf16.mxu1 %v3020_v34  ;;  %v3108_v34 = vld [vmem:[%s3672_s2 + $0x40] ss:$8 sps:$4 sm:$0xff]  }
  0x9f   :  { %1469 = vmatpush1.bf16.msra.mxu0 %v3021_v52  ;;  %v3116_v52 = vld [vmem:[%s3672_s2 + $0x24] ss:$8 sps:$4 sm:$0xff]  }
  0xa0   :  { %1506 = vmatpush1.bf16.msra.mxu1 %v3018_v37  ;;  %1470 = vmatprep.subr.bf16.mxu0 %v3029_v39  ;;  %v3111_v37 = vld [vmem:[%s3672_s2 + $0x30] ss:$8 sps:$4 sm:$0xff]   ;;  %v3150_v39 = vld [vmem:[%s3672_s2 + $0x160] ss:$8 sps:$4 sm:$0xff]  }
  0xa1   :  { %1507 = vmatprep.subr.bf16.mxu1 %v3026_v38  ;;  %v3152_v38 = vld [vmem:[%s3672_s2 + $0x164] ss:$8 sps:$4 sm:$0xff]  }
  0xa3   :  { %1471 = vmatpush1.bf16.msra.mxu0 %v3027_v8  ;;  %v3155_v8 = vld [vmem:[%s3672_s2 + $0x154] ss:$8 sps:$4 sm:$0xff]  }
  0xa4   :  { %1508 = vmatpush1.bf16.msra.mxu1 %v3024_v40  ;;  %1472 = vmatprep.subr.bf16.mxu0 %v3035_v42  ;;  %v3114_v40 = vld [vmem:[%s3672_s2 + $0x20] ss:$8 sps:$4 sm:$0xff]   ;;  %v3117_v42 = vld [vmem:[%s3672_s2 + $0x10] ss:$8 sps:$4 sm:$0xff]  }
  0xa5   :  { %1509 = vmatprep.subr.bf16.mxu1 %v3032_v41  ;;  %v3153_v41 = vld [vmem:[%s3672_s2 + $0x150] ss:$8 sps:$4 sm:$0xff]  }
  0xa7   :  { %1473 = vmatpush1.bf16.msra.mxu0 %v3033_v44  ;;  %v3122_v44 = vld [vmem:[%s3672_s2 + $0x4] ss:$8 sps:$4 sm:$0xff]  }
  0xa8   :  { %1510 = vmatpush1.bf16.msra.mxu1 %v3030_v43  ;;  %1474 = vmatprep.subr.bf16.mxu0 %v3041_v45  ;;  %v3158_v43 = vld [vmem:[%s3672_s2 + $0x144] ss:$8 sps:$4 sm:$0xff]   ;;  %v3120_v45 = vld [vmem:[%s3672_s2] ss:$8 sps:$4 sm:$0xff]  }
  0xa9   :  { %1511 = vmatprep.subr.bf16.mxu1 %v3038_v36  ;;  %v3156_v36 = vld [vmem:[%s3672_s2 + $0x140] ss:$8 sps:$4 sm:$0xff]  }
  0xab   :  { %1475 = vmatpush1.bf16.msra.mxu0 %v3039_v47  ;;  %v3125_v47 = vld [vmem:[%s3672_s2 + $0xf4] ss:$8 sps:$4 sm:$0xff]  }
  0xac   :  { %1512 = vmatpush1.bf16.msra.mxu1 %v3036_v46  ;;  %1476 = vmatprep.subr.bf16.mxu0 %v3047_v49  ;;  %v3161_v46 = vld [vmem:[%s3672_s2 + $0x134] ss:$8 sps:$4 sm:$0xff]   ;;  %v3123_v49 = vld [vmem:[%s3672_s2 + $0xf0] ss:$8 sps:$4 sm:$0xff]  }
  0xad   :  { %1513 = vmatprep.subr.bf16.mxu1 %v3044_v48  ;;  %v3159_v48 = vld [vmem:[%s3672_s2 + $0x130] ss:$8 sps:$4 sm:$0xff]  }
  0xaf   :  { %1477 = vmatpush2.bf16.msra.mxu0 %v3045_v51  ;;  %v3128_v51 = vld [vmem:[%s3672_s2 + $0xe4] ss:$8 sps:$4 sm:$0xff]  }
  0xb0   :  { %1514 = vmatpush1.bf16.msra.mxu1 %v3042_v50  ;;  %1478 = vmatprep.subr.bf16.mxu0 %v3053_v54  ;;  %v3164_v50 = vld [vmem:[%s3672_s2 + $0x124] ss:$8 sps:$4 sm:$0xff]   ;;  %v3126_v54 = vld [vmem:[%s3672_s2 + $0xe0] ss:$8 sps:$4 sm:$0xff]  }
  0xb1   :  { %1515 = vmatprep.subr.bf16.mxu1 %v3050_v53  ;;  %v3162_v53 = vld [vmem:[%s3672_s2 + $0x120] ss:$8 sps:$4 sm:$0xff]  }
  0xb3   :  { %1479 = vmatpush2.bf16.msra.mxu0 %v3051_v56  ;;  %v3131_v56 = vld [vmem:[%s3672_s2 + $0xd4] ss:$8 sps:$4 sm:$0xff]  }
  0xb4   :  { %1516 = vmatpush1.bf16.msra.mxu1 %v3048_v55  ;;  %1480 = vmatprep.subr.bf16.mxu0 %v3059_v58  ;;  %v3167_v55 = vld [vmem:[%s3672_s2 + $0x114] ss:$8 sps:$4 sm:$0xff]   ;;  %v3129_v58 = vld [vmem:[%s3672_s2 + $0xd0] ss:$8 sps:$4 sm:$0xff]  }
  0xb5   :  { %1517 = vmatprep.subr.bf16.mxu1 %v3056_v57  ;;  %v3165_v57 = vld [vmem:[%s3672_s2 + $0x110] ss:$8 sps:$4 sm:$0xff]  }
  0xb7   :  { %1481 = vmatpush2.bf16.msra.mxu0 %v3057_v60  ;;  %v3134_v60 = vld [vmem:[%s3672_s2 + $0xc4] ss:$8 sps:$4 sm:$0xff]  }
  0xb8   :  { %1518 = vmatpush2.bf16.msra.mxu1 %v3054_v59  ;;  %1482 = vmatprep.subr.bf16.mxu0 %v3065_v62  ;;  %v3170_v59 = vld [vmem:[%s3672_s2 + $0x104] ss:$8 sps:$4 sm:$0xff]   ;;  %v3132_v62 = vld [vmem:[%s3672_s2 + $0xc0] ss:$8 sps:$4 sm:$0xff]  }
  0xb9   :  { %1519 = vmatprep.subr.bf16.mxu1 %v3062_v61  ;;  %v3168_v61 = vld [vmem:[%s3672_s2 + $0x100] ss:$8 sps:$4 sm:$0xff]  }
  0xbb   :  { %1483 = vmatpush2.bf16.msra.mxu0 %v3063_v0  ;;  %v3137_v0 = vld [vmem:[%s3672_s2 + $0xb4] ss:$8 sps:$4 sm:$0xff]  }
  0xbc   :  { %1520 = vmatpush2.bf16.msra.mxu1 %v3060_v63  ;;  %1484 = vmatprep.subr.bf16.mxu0 %v3071_v2  ;;  %v3173_v63 = vld [vmem:[%s3672_s2 + $0x1f4] ss:$8 sps:$4 sm:$0xff]   ;;  %v3135_v2 = vld [vmem:[%s3672_s2 + $0xb0] ss:$8 sps:$4 sm:$0xff]  }
  0xbd   :  { %1521 = vmatprep.subr.bf16.mxu1 %v3068_v1  ;;  %v3171_v1 = vld [vmem:[%s3672_s2 + $0x1f0] ss:$8 sps:$4 sm:$0xff]  }
  0xbf   :  { %1485 = vmatpush2.bf16.msra.mxu0 %v3069_v4  ;;  %v3140_v4 = vld [vmem:[%s3672_s2 + $0xa4] ss:$8 sps:$4 sm:$0xff]  }
  0xc0   :  { %1522 = vmatpush2.bf16.msra.mxu1 %v3066_v3  ;;  %1486 = vmatprep.subr.bf16.mxu0 %v3077_v6  ;;  %v3176_v3 = vld [vmem:[%s3672_s2 + $0x1e4] ss:$8 sps:$4 sm:$0xff]   ;;  %v3138_v6 = vld [vmem:[%s3672_s2 + $0xa0] ss:$8 sps:$4 sm:$0xff]  }
  0xc1   :  { %1523 = vmatprep.subr.bf16.mxu1 %v3074_v5  ;;  %v3174_v5 = vld [vmem:[%s3672_s2 + $0x1e0] ss:$8 sps:$4 sm:$0xff]  }
  0xc3   :  { %1487 = vmatpush2.bf16.msra.mxu0 %v3075_v10  ;;  %v3141_v10 = vld [vmem:[%s3672_s2 + $0x90] ss:$8 sps:$4 sm:$0xff]  }
  0xc4   :  { %1524 = vmatpush2.bf16.msra.mxu1 %v3072_v7  ;;  %1488 = vmatprep.subr.bf16.mxu0 %v3083_v12  ;;  %v3143_v7 = vld [vmem:[%s3672_s2 + $0x94] ss:$8 sps:$4 sm:$0xff]   ;;  %v3144_v12 = vld [vmem:[%s3672_s2 + $0x80] ss:$8 sps:$4 sm:$0xff]  }
  0xc5   :  { %1525 = vmatprep.subr.bf16.mxu1 %v3080_v11  ;;  %v3146_v11 = vld [vmem:[%s3672_s2 + $0x84] ss:$8 sps:$4 sm:$0xff]  }
  0xc7   :  { %1489 = vmatpush2.bf16.msra.mxu0 %v3081_v14 }
  0xc8   :  { %1526 = vmatpush2.bf16.msra.mxu1 %v3078_v13  ;;  %1490 = vmatprep.subr.bf16.mxu0 %v3089_v17  ;;  %v3177_v17 = vld [vmem:[%s3672_s2 + $0x1d0] ss:$8 sps:$4 sm:$0xff]  }
  0xc9   :  { %1527 = vmatprep.subr.bf16.mxu1 %v3086_v15  ;;  %v3179_v15 = vld [vmem:[%s3672_s2 + $0x1d4] ss:$8 sps:$4 sm:$0xff]  }
  0xcb   :  { %1491 = vmatpush2.bf16.msra.mxu0 %v3087_v21 }
  0xcc   :  { %1528 = vmatpush2.bf16.msra.mxu1 %v3084_v18  ;;  %1983 = vmatprep.subr.bf16.mxu0 %v3101_v23  ;;  %v3182_v23 = vld [vmem:[%s3672_s2 + $0x1c4] ss:$8 sps:$4 sm:$0xff]  }
  0xcd   :  { %1529 = vmatprep.subr.bf16.mxu1 %v3092_v22  ;;  %v3180_v22 = vld [vmem:[%s3672_s2 + $0x1c0] ss:$8 sps:$4 sm:$0xff]  }
  0xce   :  { %1493 = vmatmul.mubr.bf16.vlgmr.msra.gmra.mxu0 %v3314_v9  ;;  %v3105_v9 = vld [vmem:[%s3672_s2 + $0x50] ss:$8 sps:$4 sm:$0xff]  }
  0xcf   :  { %1984 = vmatpush1.bf16.msra.mxu0 %v3099_v25 }
  0xd0   :  { %1530 = vmatpush2.bf16.msra.mxu1 %v3090_v24  ;;  %1985 = vmatprep.subr.bf16.mxu0 %v3104_v27 }
  0xd1   :  { %1531 = vmatprep.subr.bf16.mxu1 %v3095_v26 }
  0xd3   :  { %1986 = vmatpush1.bf16.msra.mxu0 %v3102_v29  ;;  %v3185_v29 = vld [vmem:[%s3672_s2 + $0x1b4] ss:$8 sps:$4 sm:$0xff]  }
  0xd4   :  { %1532 = vmatpush2.bf16.msra.mxu1 %v3093_v28  ;;  %1987 = vmatprep.subr.bf16.mxu0 %v3107_v31 }
  0xd5   :  { %1556 = vmatprep.subr.bf16.mxu1 %v3098_v30  ;;  %v3183_v30 = vld [vmem:[%s3672_s2 + $0x1b0] ss:$8 sps:$4 sm:$0xff]  }
  0xd7   :  { %1534 = vmatmul.mubr.bf16.vlgmr.msra.gmra.mxu1 %v3336_v20  ;;  %1988 = vmatpush1.bf16.msra.mxu0 %v3105_v9  ;;  %v3147_v20 = vld [vmem:[%s3672_s2 + $0x170] ss:$8 sps:$4 sm:$0xff]   ;;  %v3188_v9 = vld [vmem:[%s3672_s2 + $0x1a4] ss:$8 sps:$4 sm:$0xff]  }
  0xd8   :  { %1557 = vmatpush1.bf16.msra.mxu1 %v3096_v32  ;;  %1574 = vmatprep.mubr.bf16.mxu1 %v3248_v16  ;;  %v3149_v16 = vld [vmem:[%s3672_s2 + $0x174] ss:$8 sps:$4 sm:$0xff]  }
  0xd9   :  { %1989 = vmatprep.subr.bf16.mxu0 %v3110_v33  ;;  %2024 = vmatprep.subr.bf16.mxu1 %v3149_v16  ;;  %v3186_v33 = vld [vmem:[%s3672_s2 + $0x1a0] ss:$8 sps:$4 sm:$0xff]  }
  0xda   :  { %v3192_v16 = vld [vmem:[%s3672_s2 + $0x180] ss:$8 sps:$4 sm:$0xff]  }
  0xdb   :  { %1990 = vmatpush1.bf16.msra.mxu0 %v3108_v34 }
  0xdc   :  { %1991 = vmatprep.subr.bf16.mxu0 %v3113_v35  ;;  %v3191_v35 = vld [vmem:[%s3672_s2 + $0x194] ss:$8 sps:$4 sm:$0xff]  }
  0xdf   :  { %2637 = vmatmul.mubr.msk.bf16.vlgmr.msra.gmra.mxu1 %vm1251_vm0, %v3322_v19  ;;  %1992 = vmatpush1.bf16.msra.mxu0 %v3111_v37  ;;  %v3119_v19 = vld [vmem:[%s3672_s2 + $0x14] ss:$8 sps:$4 sm:$0xff]   ;;  %v3189_v37 = vld [vmem:[%s3672_s2 + $0x190] ss:$8 sps:$4 sm:$0xff]  }
  0xe0   :  { %2025 = vmatpush1.bf16.msra.mxu1 %v3147_v20  ;;  %1993 = vmatprep.subr.bf16.mxu0 %v3116_v52  ;;  %v3194_v20 = vld [vmem:[%s3672_s2 + $0x184] ss:$8 sps:$4 sm:$0xff]   ;;  %v255_v52 = vlaneseq }
  0xe1   :  { %2026 = vmatprep.subr.bf16.mxu1 %v3152_v38 }
  0xe2   :  { %v3539_v38 = vshrl.u32 %v255_v52, 7  ;;  %v3204_v52 = vld [vmem:[%s3673_s3 + $0x18] sm:$0xff]  }
  0xe3   :  { %1994 = vmatpush1.bf16.msra.mxu0 %v3114_v40  ;;  %v3545_v40 = vld [vmem:[%s3676_s6] sm:$0x1f] }
  0xe4   :  { %2027 = vmatpush1.bf16.msra.mxu1 %v3150_v39  ;;  %1995 = vmatprep.subr.bf16.mxu0 %v3119_v19  ;;  %v257_v39 = vsub.s32 0, %v3539_v38 }
  0xe5   :  { %2028 = vmatprep.subr.bf16.mxu1 %v3155_v8  ;;  %v3550_v8 = vld [vmem:[%s3676_s6 + $0x8] sm:$0x1f] }
  0xe6   :  { %v258_v19 = vrot.slane %v3545_v40, %v257_v39 }
  0xe7   :  { %1996 = vmatpush1.bf16.msra.mxu0 %v3117_v42 }
  0xe8   :  { %2029 = vmatpush1.bf16.msra.mxu1 %v3153_v41  ;;  %1997 = vmatprep.subr.bf16.mxu0 %v3122_v44  ;;  %v262_v41 = vrot.slane %v3550_v8, %v257_v39 }
  0xe9   :  { %2030 = vmatprep.subr.bf16.mxu1 %v3158_v43 }
  0xeb   :  { %1998 = vmatpush1.bf16.msra.mxu0 %v3120_v45 }
  0xec   :  { %2031 = vmatpush1.bf16.msra.mxu1 %v3156_v36  ;;  %1999 = vmatprep.subr.bf16.mxu0 %v3125_v47 }
  0xed   :  { %2032 = vmatprep.subr.bf16.mxu1 %v3161_v46 }
  0xef   :  { %2000 = vmatpush2.bf16.msra.mxu0 %v3123_v49 }
  0xf0   :  { %2033 = vmatpush1.bf16.msra.mxu1 %v3159_v48  ;;  %2001 = vmatprep.subr.bf16.mxu0 %v3128_v51 }
  0xf1   :  { %2034 = vmatprep.subr.bf16.mxu1 %v3164_v50 }
  0xf3   :  { %2002 = vmatpush2.bf16.msra.mxu0 %v3126_v54 }
  0xf4   :  { %2035 = vmatpush1.bf16.msra.mxu1 %v3162_v53  ;;  %2003 = vmatprep.subr.bf16.mxu0 %v3131_v56 }
  0xf5   :  { %2036 = vmatprep.subr.bf16.mxu1 %v3167_v55 }
  0xf7   :  { %2004 = vmatpush2.bf16.msra.mxu0 %v3129_v58 }
  0xf8   :  { %2037 = vmatpush1.bf16.msra.mxu1 %v3165_v57  ;;  %2005 = vmatprep.subr.bf16.mxu0 %v3134_v60 }
  0xf9   :  { %2038 = vmatprep.subr.bf16.mxu1 %v3170_v59 }
  0xfb   :  { %2006 = vmatpush2.bf16.msra.mxu0 %v3132_v62 }
  0xfc   :  { %2039 = vmatpush1.bf16.msra.mxu1 %v3168_v61  ;;  %2007 = vmatprep.subr.bf16.mxu0 %v3137_v0  ;;  %v43_v0 = vld [vmem:[%s3676_s6 + $0x10] sm:$0x1f] }
  0xfd   :  { %2040 = vmatprep.subr.bf16.mxu1 %v3173_v63 }
  0xff   :  { %2008 = vmatpush2.bf16.msra.mxu0 %v3135_v2  ;;  %v44_v2 = vld [vmem:[%s3676_s6 + $0x18] sm:$0x1f] }
 0x100   :  { %2041 = vmatpush2.bf16.msra.mxu1 %v3171_v1  ;;  %2009 = vmatprep.subr.bf16.mxu0 %v3140_v4  ;;  %v266_v4 = vrot.slane %v43_v0, %v257_v39 }
 0x101   :  { %2042 = vmatprep.subr.bf16.mxu1 %v3176_v3 }
 0x103   :  { %2010 = vmatpush2.bf16.msra.mxu0 %v3138_v6  ;;  %v270_v6 = vrot.slane %v44_v2, %v257_v39  ;;  %v3205_v39 = vld [vmem:[%s3673_s3 + $0x50] sm:$0xff]  }
 0x104   :  { %2043 = vmatpush2.bf16.msra.mxu1 %v3174_v5  ;;  %2011 = vmatprep.subr.bf16.mxu0 %v3143_v7 }
 0x105   :  { %2044 = vmatprep.subr.bf16.mxu1 %v3179_v15 }
 0x107   :  { %2012 = vmatpush2.bf16.msra.mxu0 %v3141_v10 }
 0x108   :  { %2013 = vmatprep.subr.bf16.mxu0 %v3146_v11  ;;  %2045 = vmatpush2.bf16.msra.mxu1 %v3177_v17 }
 0x109   :  { %2046 = vmatprep.subr.bf16.mxu1 %v3182_v23 }
 0x10b   :  { %2014 = vmatpush2.bf16.msra.mxu0 %v3144_v12 }
 0x10c   :  { %2047 = vmatpush2.bf16.msra.mxu1 %v3180_v22 }
 0x10d   :  { %2048 = vmatprep.subr.bf16.mxu1 %v3185_v29 }
 0x10e   :  { %v1289_v13 = vpop.f32.mrf.mxu0 }
 0x10f   :  { %v1330_v14 = vpop.f32.mrf.mxu1  ;;  %v1290_v42 = vadd.f32 %v1289_v13, %v258_v19  ;;  %v3206_v19 = vld [vmem:[%s3673_s3 + $0x10] sm:$0xff]  }
 0x110   :  { %v1291_v18 = vpop.f32.mrf.mxu0  ;;  %2049 = vmatpush2.bf16.msra.mxu1 %v3183_v30 }
 0x111   :  { %v1332_v21 = vpop.f32.mrf.mxu1  ;;  %2050 = vmatprep.subr.bf16.mxu1 %v3188_v9  ;;  %v1292_v43 = vadd.f32 %v1291_v18, %v262_v41  ;;  %v1331_v44 = vadd.f32 %v1330_v14, %v1290_v42  ;;  %v3199_v9 = vld [vmem:[%s3673_s3 + $0x68] sm:$0xff]  }
 0x112   :  { %v1293_v25 = vpop.f32.mrf.mxu0  ;;  %v3207_v41 = vld [vmem:[%s3673_s3 + $0x48] sm:$0xff]  }
 0x113   :  { %v1334_v24 = vpop.f32.mrf.mxu1  ;;  %v1333_v45 = vadd.f32 %v1332_v21, %v1292_v43  ;;  %v3196_v25 = vld [vmem:[%s3673_s3 + $0x38] sm:$0xff]   ;;  %v3208_v42 = vld [vmem:[%s3673_s3 + $0x8] sm:$0xff]   ;;  %v3209_v43 = vld [vmem:[%s3673_s3 + $0x40] sm:$0xff]  }
 0x114   :  { %v1294_v27 = vpop.f32.mrf.mxu0  ;;  %2051 = vmatpush2.bf16.msra.mxu1 %v3186_v33  ;;  %v3195_v24 = vld [vmem:[%s3673_s3 + $0x78] sm:$0xff]  }
 0x115   :  { %v1335_v26 = vpop.f32.mrf.mxu1  ;;  %2052 = vmatprep.subr.bf16.mxu1 %v3191_v35  ;;  %2731 = vmatprep.subr.bf16.mxu0 %v3195_v24  ;;  %v3200_v35 = vld [vmem:[%s3673_s3 + $0x28] sm:$0xff]  }
 0x116   :  { %v3197_v26 = vld [vmem:[%s3673_s3 + $0x70] sm:$0xff]  }
 0x117   :  { %v1412_v28 = vpop.f32.mrf.mxu1 }
 0x118   :  { %2053 = vmatpush2.bf16.msra.mxu1 %v3189_v37  ;;  %v3201_v37 = vld [vmem:[%s3673_s3 + $0x60] sm:$0xff]  }
 0x119   :  { %v1414_v31 = vpop.f32.mrf.mxu1  ;;  %2054 = vmatprep.subr.bf16.mxu1 %v3194_v20  ;;  %v3202_v20 = vld [vmem:[%s3673_s3 + $0x20] sm:$0xff]  }
 0x11b   :  { %v1416_v32 = vpop.f32.mrf.mxu1 }
 0x11c   :  { %2055 = vmatpush2.bf16.msra.mxu1 %v3192_v16  ;;  %v3203_v16 = vld [vmem:[%s3673_s3 + $0x58] sm:$0xff]  }
 0x11d   :  { %v1417_v34 = vpop.f32.mrf.mxu1 }
 0x14e   :  { %v1371_v36 = vpop.f32.mrf.mxu0 }
 0x14f   :  { %v1372_v46 = vadd.f32 %v1371_v36, %v1331_v44  ;;  %v3210_v44 = vld [vmem:[%s3673_s3] sm:$0xff]   ;;  %v3211_v36 = vld [vmem:[%s3674_s4 + $0x38] sm:$0xff]  }
 0x150   :  { %v1373_v47 = vpop.f32.mrf.mxu0 }
 0x151   :  { %v1413_v48 = vadd.f32 %v1412_v28, %v1372_v46  ;;  %v1374_v49 = vadd.f32 %v1373_v47, %v1333_v45  ;;  %v3249_v45 = vmov 0.0   ;;  %v3212_v46 = vld [vmem:[%s3674_s4 + $0x30] sm:$0xff]   ;;  %v3213_v47 = vld [vmem:[%s3674_s4 + $0x28] sm:$0xff]  }
 0x152   :  { %v1375_v50 = vpop.f32.mrf.mxu0  ;;  %2767 = vmatprep.subr.bf16.mxu1 %v3249_v45 }
 0x153   :  { %v1415_v51 = vadd.f32 %v1414_v31, %v1374_v49  ;;  %v1583_v53 = vmax.f32 %v1413_v48, 0.0  ;;  %v3198_v31 = vld [vmem:[%s3673_s3 + $0x30] sm:$0xff]   ;;  %v3214_v48 = vld [vmem:[%s3674_s4 + $0x20] sm:$0xff]   ;;  %v3215_v49 = vld [vmem:[%s3674_s4 + $0x18] sm:$0xff]  }
 0x154   :  { %v1376_v54 = vpop.f32.mrf.mxu0 }
 0x155   :  { %v1584_v55 = vmax.f32 %v1415_v51, 0.0  ;;  %v1587_v58 = vpack.c.bf16 %v1583_v53, %v1583_v53 }
 0x157   :  { %v1453_v56 = vpop.f32.mrf.mxu1  ;;  %v1588_v57 = vpack.c.bf16 %v1584_v55, %v1584_v55  ;;  %v1657_v55 = vsub.s32 1, %v3539_v38 }
 0x158   :  { %v1454_v10 = vadd.f32 %v1453_v56, %v266_v4 }
 0x159   :  { %v1455_v59 = vpop.f32.mrf.mxu1  ;;  %2015 = vmatprep.mubr.bf16.mxu0 %v1588_v57  ;;  %v1658_v56 = vrot.slane %v3545_v40, %v1657_v55  ;;  %v1662_v57 = vrot.slane %v3550_v8, %v1657_v55  ;;  %v3217_v8 = vld [vmem:[%s3674_s4 + $0x8] sm:$0xff]  }
 0x15a   :  { %2016 = vmatmul.mubr.bf16.vlgmr.msra.gmra.mxu0 %v1587_v58  ;;  %v1456_v12 = vadd.f32 %v1455_v59, %v270_v6  ;;  %v3216_v6 = vld [vmem:[%s3674_s4 + $0x10] sm:$0xff]  }
 0x15b   :  { %v1457_v60 = vpop.f32.mrf.mxu1  ;;  %2732 = vmatpush3.bf16.msra.mxu0 %v3196_v25  ;;  %v3221_v25 = vld [vmem:[%s3675_s5 + $0x8] sm:$0xff]  }
 0x15c   :  { %2733 = vmatprep.subr.bf16.mxu0 %v3197_v26  ;;  %v3222_v26 = vld [vmem:[%s3675_s5] sm:$0xff]  }
 0x15d   :  { %v1458_v61 = vpop.f32.mrf.mxu1 }
 0x15f   :  { %2734 = vmatpush3.bf16.msra.mxu0 %v3198_v31 }
 0x160   :  { %2735 = vmatprep.subr.bf16.mxu0 %v3199_v9 }
 0x163   :  { %2736 = vmatpush3.bf16.msra.mxu0 %v3200_v35  ;;  %v2363_v35 = vsub.s32 4, %v3539_v38 }
 0x164   :  { %2737 = vmatprep.subr.bf16.mxu0 %v3201_v37 }
 0x165   :  { %v2364_v37 = vrot.slane %v3545_v40, %v2363_v35 }
 0x167   :  { %2738 = vmatpush3.bf16.msra.mxu0 %v3202_v20 }
 0x168   :  { %2739 = vmatprep.subr.bf16.mxu0 %v3203_v16 }
 0x16b   :  { %2740 = vmatpush3.bf16.msra.mxu0 %v3204_v52 }
 0x16c   :  { %2741 = vmatprep.subr.bf16.mxu0 %v3205_v39 }
 0x16f   :  { %2742 = vmatpush3.bf16.msra.mxu0 %v3206_v19 }
 0x170   :  { %2743 = vmatprep.subr.bf16.mxu0 %v3207_v41 }
 0x173   :  { %2744 = vmatpush3.bf16.msra.mxu0 %v3208_v42 }
 0x174   :  { %2745 = vmatprep.subr.bf16.mxu0 %v3209_v43 }
 0x177   :  { %2746 = vmatpush3.bf16.msra.mxu0 %v3210_v44 }
 0x178   :  { %2787 = vmatprep.subr.bf16.mxu0 %v3249_v45 }
 0x18e   :  { %v1494_v62 = vpop.f32.mrf.mxu0 }
 0x18f   :  { %v1495_v13 = vadd.f32 %v1494_v62, %v1454_v10  ;;  %v3219_v10 = vld [vmem:[%s3675_s5 + $0x18] sm:$0xff]  }
 0x190   :  { %v1496_v63 = vpop.f32.mrf.mxu0 }
 0x191   :  { %v1497_v15 = vadd.f32 %v1496_v63, %v1456_v12  ;;  %v2103_v12 = vsub.s32 2, %v3539_v38 }
 0x192   :  { %v1498_v1 = vpop.f32.mrf.mxu0 }
 0x194   :  { %v1499_v3 = vpop.f32.mrf.mxu0 }
 0x197   :  { %v1535_v5 = vpop.f32.mrf.mxu1 }
 0x198   :  { %v1536_v17 = vadd.f32 %v1535_v5, %v1495_v13 }
 0x199   :  { %v1537_v7 = vpop.f32.mrf.mxu1 }
 0x19a   :  { %v1538_v21 = vadd.f32 %v1537_v7, %v1497_v15  ;;  %v3218_v7 = vld [vmem:[%s3674_s4] sm:$0xff]  }
 0x19b   :  { %v1539_v11 = vpop.f32.mrf.mxu1 }
 0x19c   :  { %v3220_v11 = vld [vmem:[%s3675_s5 + $0x10] sm:$0xff]  }
 0x19d   :  { %v1540_v14 = vpop.f32.mrf.mxu1 }
 0x19e   :  { %v2104_v14 = vrot.slane %v3545_v40, %v2103_v12 }
 0x19f   :  { %v1576_v18 = vpop.f32.mrf.mxu1 }
 0x1a0   :  { %v1577_v22 = vadd.f32 %v1576_v18, %v1536_v17 }
 0x1a1   :  { %v1578_v23 = vpop.f32.mrf.mxu1 }
 0x1a2   :  { %v1579_v27 = vadd.f32 %v1578_v23, %v1538_v21  ;;  %v1585_v28 = vmax.f32 %v1577_v22, 0.0 }
 0x1a3   :  { %v1580_v29 = vpop.f32.mrf.mxu1 }
 0x1a4   :  { %v1586_v30 = vmax.f32 %v1579_v27, 0.0  ;;  %v1589_v34 = vpack.c.bf16 %v1585_v28, %v1585_v28  ;;  %v2261_v27 = vsub.s32 3, %v3539_v38 }
 0x1a5   :  { %v1581_v32 = vpop.f32.mrf.mxu1 }
 0x1a6   :  { %v1590_v33 = vpack.c.bf16 %v1586_v30, %v1586_v30  ;;  %v2262_v28 = vrot.slane %v3545_v40, %v2261_v27 }
 0x1a8   :  { %2056 = vmatprep.mubr.bf16.mxu1 %v1590_v33 }
 0x1a9   :  { %2057 = vmatmul.mubr.bf16.vlgmr.msra.gmra.mxu1 %v1589_v34 }
 0x1aa   :  { %2768 = vmatpush3.bf16.msra.mxu1 %v3211_v36  ;;  %2783 = vmatprep.mubr.msk.bf16.mxu1 %vm3250_vm1, %v3249_v45 }
 0x1ab   :  { %2769 = vmatprep.subr.bf16.mxu1 %v3249_v45 }
 0x1ae   :  { %2770 = vmatpush3.bf16.msra.mxu1 %v3212_v46 }
 0x1af   :  { %2771 = vmatprep.subr.bf16.mxu1 %v3249_v45 }
 0x1b2   :  { %2772 = vmatpush3.bf16.msra.mxu1 %v3213_v47 }
 0x1b3   :  { %2773 = vmatprep.subr.bf16.mxu1 %v3249_v45 }
 0x1b6   :  { %2774 = vmatpush3.bf16.msra.mxu1 %v3214_v48 }
 0x1b7   :  { %2775 = vmatprep.subr.bf16.mxu1 %v3249_v45 }
 0x1ba   :  { %2776 = vmatpush3.bf16.msra.mxu1 %v3215_v49 }
 0x1bb   :  { %2777 = vmatprep.subr.bf16.mxu1 %v3249_v45 }
 0x1be   :  { %2778 = vmatpush3.bf16.msra.mxu1 %v3216_v6 }
 0x1bf   :  { %2779 = vmatprep.subr.bf16.mxu1 %v3249_v45 }
 0x1c2   :  { %2780 = vmatpush3.bf16.msra.mxu1 %v3217_v8 }
 0x1c3   :  { %2781 = vmatprep.subr.bf16.mxu1 %v3249_v45 }
 0x1c6   :  { %2782 = vmatpush3.bf16.msra.mxu1 %v3218_v7 }
 0x21a   :  { %v2017_v50 = vpop.f32.mrf.mxu0 }
 0x21b   :  { %v2018_v58 = vadd.f32 %v2017_v50, %v1658_v56 }
 0x21c   :  { %v2019_v51 = vpop.f32.mrf.mxu0 }
 0x21d   :  { %v2020_v60 = vadd.f32 %v2019_v51, %v1662_v57 }
 0x21e   :  { %v2021_v53 = vpop.f32.mrf.mxu0 }
 0x220   :  { %v2022_v54 = vpop.f32.mrf.mxu0 }
 0x269   :  { %v2058_v59 = vpop.f32.mrf.mxu1 }
 0x26a   :  { %v2059_v61 = vadd.f32 %v2058_v59, %v2018_v58 }
 0x26b   :  { %v2060_v62 = vpop.f32.mrf.mxu1 }
 0x26c   :  { %v2061_v63 = vadd.f32 %v2060_v62, %v2020_v60  ;;  %v2065_v0 = vmax.f32 %v2059_v61, 0.0 }
 0x26d   :  { %v2062_v1 = vpop.f32.mrf.mxu1 }
 0x26e   :  { %v2066_v2 = vmax.f32 %v2061_v63, 0.0  ;;  %v2067_v5 = vpack.c.bf16 %v2065_v0, %v2065_v0 }
 0x26f   :  { %v2063_v3 = vpop.f32.mrf.mxu1 }
 0x270   :  { %v2068_v4 = vpack.c.bf16 %v2066_v2, %v2066_v2 }
 0x272   :  { %2233 = vmatprep.mubr.bf16.mxu0 %v2068_v4 }
 0x273   :  { %2234 = vmatmul.mubr.bf16.vlgmr.msra.gmra.mxu0 %v2067_v5 }
 0x274   :  { %2795 = vmatprep.mubr.msk.bf16.mxu0 %vm3250_vm1, %v3249_v45  ;;  %2788 = vmatpush3.bf16.msra.mxu0 %v3219_v10 }
 0x275   :  { %2789 = vmatprep.subr.bf16.mxu0 %v3249_v45 }
 0x278   :  { %2790 = vmatpush3.bf16.msra.mxu0 %v3220_v11 }
 0x279   :  { %2791 = vmatprep.subr.bf16.mxu0 %v3249_v45 }
 0x27c   :  { %2792 = vmatpush3.bf16.msra.mxu0 %v3221_v25 }
 0x27d   :  { %2793 = vmatprep.subr.bf16.mxu0 %v3249_v45 }
 0x280   :  { %2794 = vmatpush3.bf16.msra.mxu0 %v3222_v26 }
 0x333   :  { %v2747_v13 = vpop.f32.mrf.mxu0 }
 0x335   :  { %v2748_v15 = vpop.f32.mrf.mxu0 }
 0x336   :  { %v2749_v17 = vadd.f32 %v2748_v15, %v2747_v13 }
 0x337   :  { %v2750_v18 = vpop.f32.mrf.mxu0 }
 0x338   :  { %v2236_v21 = vadd.f32 %v2749_v17, %v2104_v14 }
 0x339   :  { %v2751_v22 = vpop.f32.mrf.mxu0 }
 0x33a   :  { %v2241_v23 = vmax.f32 %v2236_v21, 0.0 }
 0x33c   :  { %v2242_v24 = vpack.c.bf16 %v2241_v23, %v2241_v23 }
 0x33e   :  { %2784 = vmatmul.mubr.bf16.vlgmr.msra.gmra.mxu1 %v2242_v24 }
 0x3fe   :  { %v2345_v29 = vpop.f32.mrf.mxu1 }
 0x3ff   :  { %v2346_v30 = vadd.f32 %v2345_v29, %v2262_v28 }
 0x400   :  { %v2785_v31 = vpop.f32.mrf.mxu1 }
 0x401   :  { %v2351_v32 = vmax.f32 %v2346_v30, 0.0 }
 0x402   :  { %v2348_v9 = vpop.f32.mrf.mxu1 }
 0x403   :  { %v2352_v33 = vpack.c.bf16 %v2351_v32, %v2351_v32 }
 0x404   :  { %v2786_v34 = vpop.f32.mrf.mxu1 }
 0x405   :  { %2796 = vmatmul.mubr.msk.bf16.vlgmr.msra.gmra.mxu0 %vm2389_vm2, %v2352_v33 }
 0x4c5   :  { %v2427_v20 = vpop.f32.mrf.mxu0 }
 0x4c6   :  { %v2428_v16 = vadd.f32 %v2427_v20, %v2364_v37 }
 0x4c7   :  { %v2797_v52 = vpop.f32.mrf.mxu0 }
 0x4c8   :  { %v2433_v39 = vpack.c.bf16 %v2428_v16, %v2428_v16 }
 0x4c9   :  { %v2430_v19 = vpop.f32.mrf.mxu0 }
 0x4ca   :  { %2434 = vst [vmem:[%s3677_s7] sm:$0xf] %v2433_v39 }
 0x4cb   :  { %v2798_v41 = vpop.f32.mrf.mxu0 }
 0x4cc   :  { %2439 = vsyncpa [#allocation3], 1 }

</bundles_post_ra>
